<compile_context>
chip_gen: v7x
topology: tpu7x:2x2x1
jax: 0.10.0
libtpu: 0.0.40
codegen_flags: <defaults>
</compile_context>

<pallas_src>
import inspect

import jax
import jax.numpy as jnp
from jax.experimental import pallas as pl
from jax.experimental.pallas import tpu as pltpu

INPUT_SIZE = 784
HIDDEN_SIZE = 1500
NUM_CLASSES = 10
H_PAD = 1536   # hidden 1500 -> 1536: multiple of 256 (MXU granule) and of (8,128)
N_PAD = 128    # output 10 -> 128 lanes: unmasked lane-dense stores

_SUPPORTS_SINGLE_BUFFER = (
    hasattr(pl, "Buffered")
    and "pipeline_mode" in inspect.signature(pl.BlockSpec).parameters
)


def _resident_spec(shape):
    """BlockSpec for operands identical across all grid steps (weights/biases).

    Constant index_map keeps them VMEM-resident; single-buffer them when the
    installed JAX exposes pipeline_mode so we don't pay 2x VMEM for data that
    never changes.
    """
    if _SUPPORTS_SINGLE_BUFFER:
        return pl.BlockSpec(shape, lambda i: (0, 0), pipeline_mode=pl.Buffered(1))
    return pl.BlockSpec(shape, lambda i: (0, 0))


def mlp_kernel(x_ref, w1_ref, b1_ref, w2_ref, b2_ref, o_ref):
    # x arrives f32 straight from HBM; cast to bf16 on the VPU (hidden under
    # MXU/DMA work) so the wrapper never pays a separate f32->bf16 HBM pass.
    x = x_ref[...].astype(jnp.bfloat16)
    # Layer 1: bf16 operands on the MXU, f32 accumulation.
    h = jnp.dot(x, w1_ref[...], preferred_element_type=jnp.float32)
    # Bias + ReLU in f32 on the VPU.
    h = jnp.maximum(h + b1_ref[...], 0.0)
    # Layer 2: cast activations to bf16 for the MXU, accumulate in f32.
    out = jnp.dot(h.astype(jnp.bfloat16), w2_ref[...],
                  preferred_element_type=jnp.float32)
    o_ref[...] = (out + b2_ref[...]).astype(o_ref.dtype)


def prepare_params(w1, b1, w2, b2):
    """One-time packing of the nn.Linear params for the kernel (call once, reuse).

    Inputs (f32, weights transposed vs PyTorch): w1 (784,1500), b1 (1,1500),
    w2 (1500,10), b2 (1,10).  Returns bf16/zero-padded params:
      w1_p (784,1536) bf16, b1_p (1,1536) f32, w2_p (1536,128) bf16, b2_p (1,128) f32.
    Zero padding is exact: padded hidden columns stay 0 through bias+ReLU and the
    padded W2 rows/columns contribute 0, so the sliced output is unchanged.
    """
    w1_p = jnp.zeros((INPUT_SIZE, H_PAD), jnp.bfloat16)
    w1_p = w1_p.at[:, :HIDDEN_SIZE].set(w1.astype(jnp.bfloat16))
    b1_p = jnp.zeros((1, H_PAD), jnp.float32).at[:, :HIDDEN_SIZE].set(b1)
    w2_p = jnp.zeros((H_PAD, N_PAD), jnp.bfloat16)
    w2_p = w2_p.at[:HIDDEN_SIZE, :NUM_CLASSES].set(w2.astype(jnp.bfloat16))
    b2_p = jnp.zeros((1, N_PAD), jnp.float32).at[:, :NUM_CLASSES].set(b2)
    return w1_p, b1_p, w2_p, b2_p


def _pick_tm(B):
    if B <= 128:
        return max(8, ((B + 7) // 8) * 8)   # one grid step, sublane-aligned
    if B <= 1024:
        return 128                          # >=2 steps -> v7x megacore sharding
    return 512                              # large B: amortize per-step overhead


def neural_net_forward(x, params, *, tm=None):
    """x: (B, 784) f32.  params: output of prepare_params.  Returns (B, 10) f32."""
    w1_p, b1_p, w2_p, b2_p = params
    B = x.shape[0]
    if tm is None:
        tm = _pick_tm(B)
    B_pad = pl.cdiv(B, tm) * tm
    if B_pad != B:
        x = jnp.pad(x, ((0, B_pad - B), (0, 0)))

    grid = (B_pad // tm,)
    flops = 2 * B_pad * (INPUT_SIZE * H_PAD + H_PAD * N_PAD)
    bytes_accessed = (
        4 * B_pad * INPUT_SIZE                          # x f32
        + 2 * (INPUT_SIZE * H_PAD + H_PAD * N_PAD)      # weights bf16
        + 4 * (H_PAD + N_PAD)                           # biases f32
        + 4 * B_pad * N_PAD                             # out f32
    )

    out = pl.pallas_call(
        mlp_kernel,
        out_shape=jax.ShapeDtypeStruct((B_pad, N_PAD), jnp.float32),
        grid_spec=pltpu.PrefetchScalarGridSpec(
            num_scalar_prefetch=0,
            grid=grid,
            in_specs=[
                pl.BlockSpec((tm, INPUT_SIZE), lambda i: (i, 0)),  # x (batch-tiled)
                _resident_spec((INPUT_SIZE, H_PAD)),               # w1 (resident)
                _resident_spec((1, H_PAD)),                        # b1 (resident)
                _resident_spec((H_PAD, N_PAD)),                    # w2 (resident)
                _resident_spec((1, N_PAD)),                        # b2 (resident)
            ],
            out_specs=pl.BlockSpec((tm, N_PAD), lambda i: (i, 0)),
        ),
        compiler_params=pltpu.CompilerParams(
            dimension_semantics=("parallel",),   # shard batch tiles across TCs (v7x)
            vmem_limit_bytes=32 * 1024 * 1024,
        ),
        cost_estimate=pl.CostEstimate(
            flops=flops, transcendentals=0, bytes_accessed=bytes_accessed),
    )(x, w1_p, b1_p, w2_p, b2_p)

    return out[:B, :NUM_CLASSES]


def init_params(key):
    """Deterministic init mimicking nn.Linear's U(-1/sqrt(fan_in), 1/sqrt(fan_in))."""
    k1, k2, k3, k4 = jax.random.split(key, 4)
    bound1 = 1.0 / jnp.sqrt(jnp.float32(INPUT_SIZE))
    bound2 = 1.0 / jnp.sqrt(jnp.float32(HIDDEN_SIZE))
    # Stored as (in, out): transposed relative to PyTorch's (out, in) weight layout.
    w1 = jax.random.uniform(k1, (INPUT_SIZE, HIDDEN_SIZE), jnp.float32, -bound1, bound1)
    b1 = jax.random.uniform(k2, (1, HIDDEN_SIZE), jnp.float32, -bound1, bound1)
    w2 = jax.random.uniform(k3, (HIDDEN_SIZE, NUM_CLASSES), jnp.float32, -bound2, bound2)
    b2 = jax.random.uniform(k4, (1, NUM_CLASSES), jnp.float32, -bound2, bound2)
    return w1, b1, w2, b2


if __name__ == "__main__":
    key = jax.random.PRNGKey(0)
    k_x, k_p = jax.random.split(key)
    batch = 8
    x = jax.random.normal(k_x, (batch, INPUT_SIZE), jnp.float32)
    w1, b1, w2, b2 = init_params(k_p)

    # One-time param packing (bf16 cast + hidden/output padding), then forward.
    params = prepare_params(w1, b1, w2, b2)
    params = jax.block_until_ready(params)

    out = neural_net_forward(x, params)
    out = jax.block_until_ready(out)

    # Sanity check against plain-JAX f32 reference (bf16 operands -> relaxed tolerance).
    ref = jnp.maximum(x @ w1 + b1, 0.0) @ w2 + b2
    assert out.shape == (batch, NUM_CLASSES)
    assert jnp.allclose(out, ref, atol=2e-2, rtol=2e-2), (
        float(jnp.max(jnp.abs(out - ref))))

    print("KERNEL_OK")
</pallas_src>

<mosaic_0001>
module attributes {stable_mosaic.version = 11 : i64} {
  func.func @mlp_kernel(%arg0: i32, %arg1: memref<8x784xf32, #tpu.memory_space<vmem>>, %arg2: memref<784x1536xbf16, #tpu.memory_space<vmem>>, %arg3: memref<1x1536xf32, #tpu.memory_space<vmem>>, %arg4: memref<1536x128xbf16, #tpu.memory_space<vmem>>, %arg5: memref<1x128xf32, #tpu.memory_space<vmem>>, %arg6: memref<8x128xf32, #tpu.memory_space<vmem>>) attributes {dimension_semantics = [#tpu.dimension_semantics<parallel>], iteration_bounds = array<i64: 1>, scalar_prefetch = 0 : i64, scratch_operands = 0 : i64, tpu.core_type = #tpu.core_type<tc>, window_params = [{transform_indices = @transform_0, window_bounds = array<i64: 8, 784>}, {pipeline_mode = #tpu.pipeline_mode<synchronous>, transform_indices = @transform_1, window_bounds = array<i64: 784, 1536>}, {pipeline_mode = #tpu.pipeline_mode<synchronous>, transform_indices = @transform_2, window_bounds = array<i64: 1, 1536>}, {pipeline_mode = #tpu.pipeline_mode<synchronous>, transform_indices = @transform_3, window_bounds = array<i64: 1536, 128>}, {pipeline_mode = #tpu.pipeline_mode<synchronous>, transform_indices = @transform_4, window_bounds = array<i64: 1, 128>}, {transform_indices = @transform_5, window_bounds = array<i64: 8, 128>}]} {
    %c0 = arith.constant 0 : index
    %c0_0 = arith.constant 0 : index
    %0 = vector.load %arg1[%c0, %c0_0] : memref<8x784xf32, #tpu.memory_space<vmem>>, vector<8x784xf32>
    %1 = arith.truncf %0 : vector<8x784xf32> to vector<8x784xbf16>
    %c0_1 = arith.constant 0 : index
    %c0_2 = arith.constant 0 : index
    %2 = vector.load %arg2[%c0_1, %c0_2] : memref<784x1536xbf16, #tpu.memory_space<vmem>>, vector<784x1536xbf16>
    %cst = arith.constant dense<0.000000e+00> : vector<8x1536xf32>
    %3 = tpu.matmul %1, %2, %cst {dimension_numbers = #tpu.dot_dimension_numbers<[1], [0], [0], [1], [0, 0, 1, 1], [], []>} : vector<8x784xbf16>, vector<784x1536xbf16>, vector<8x1536xf32> -> vector<8x1536xf32>
    %c0_3 = arith.constant 0 : index
    %c0_4 = arith.constant 0 : index
    %4 = vector.load %arg3[%c0_3, %c0_4] : memref<1x1536xf32, #tpu.memory_space<vmem>>, vector<1x1536xf32>
    %5 = vector.broadcast %4 : vector<1x1536xf32> to vector<8x1536xf32>
    %6 = arith.addf %3, %5 : vector<8x1536xf32>
    %cst_5 = arith.constant 0.000000e+00 : f32
    %7 = vector.broadcast %cst_5 : f32 to vector<8x1536xf32>
    %8 = arith.maximumf %6, %7 : vector<8x1536xf32>
    %9 = arith.truncf %8 : vector<8x1536xf32> to vector<8x1536xbf16>
    %c0_6 = arith.constant 0 : index
    %c0_7 = arith.constant 0 : index
    %10 = vector.load %arg4[%c0_6, %c0_7] : memref<1536x128xbf16, #tpu.memory_space<vmem>>, vector<1536x128xbf16>
    %cst_8 = arith.constant dense<0.000000e+00> : vector<8x128xf32>
    %11 = tpu.matmul %9, %10, %cst_8 {dimension_numbers = #tpu.dot_dimension_numbers<[1], [0], [0], [1], [0, 0, 1, 1], [], []>} : vector<8x1536xbf16>, vector<1536x128xbf16>, vector<8x128xf32> -> vector<8x128xf32>
    %c0_9 = arith.constant 0 : index
    %c0_10 = arith.constant 0 : index
    %12 = vector.load %arg5[%c0_9, %c0_10] : memref<1x128xf32, #tpu.memory_space<vmem>>, vector<1x128xf32>
    %13 = vector.broadcast %12 : vector<1x128xf32> to vector<8x128xf32>
    %14 = arith.addf %11, %13 : vector<8x128xf32>
    %c0_11 = arith.constant 0 : index
    %c0_12 = arith.constant 0 : index
    %15 = vector.load %arg6[%c0_11, %c0_12] : memref<8x128xf32, #tpu.memory_space<vmem>>, vector<8x128xf32>
    tpu.vector_store %arg6[%c0_11, %c0_12], %14 {strides = array<i32>} : memref<8x128xf32, #tpu.memory_space<vmem>>, vector<8x128xf32>,
    return
  }
  func.func @transform_0(%arg0: i32) -> (i32, i32) {
    %c0_i32 = arith.constant 0 : i32
    %c0_i32_0 = arith.constant 0 : i32
    return %arg0, %c0_i32 : i32, i32
  }
  func.func @transform_1(%arg0: i32) -> (i32, i32) {
    %c0_i32 = arith.constant 0 : i32
    %c0_i32_0 = arith.constant 0 : i32
    %c0_i32_1 = arith.constant 0 : i32
    return %c0_i32, %c0_i32_0 : i32, i32
  }
  func.func @transform_2(%arg0: i32) -> (i32, i32) {
    %c0_i32 = arith.constant 0 : i32
    %c0_i32_0 = arith.constant 0 : i32
    %c0_i32_1 = arith.constant 0 : i32
    return %c0_i32, %c0_i32_0 : i32, i32
  }
  func.func @transform_3(%arg0: i32) -> (i32, i32) {
    %c0_i32 = arith.constant 0 : i32
    %c0_i32_0 = arith.constant 0 : i32
    %c0_i32_1 = arith.constant 0 : i32
    return %c0_i32, %c0_i32_0 : i32, i32
  }
  func.func @transform_4(%arg0: i32) -> (i32, i32) {
    %c0_i32 = arith.constant 0 : i32
    %c0_i32_0 = arith.constant 0 : i32
    %c0_i32_1 = arith.constant 0 : i32
    return %c0_i32, %c0_i32_0 : i32, i32
  }
  func.func @transform_5(%arg0: i32) -> (i32, i32) {
    %c0_i32 = arith.constant 0 : i32
    %c0_i32_0 = arith.constant 0 : i32
    return %arg0, %c0_i32 : i32, i32
  }
}

</mosaic_0001>

<bundles_post_ra>
// kernel: tpu_custom_call.1
= control target key start
LH: loop header
LB: loop body
LE: loop exit
PB: predicated region body
PF: predicated region fallthrough
CT: control target
= control target key end

     0   :  { %10 = vsyncpa [#allocation3], 0  ;;  %s8006_s0 = inlined_call_operand.hbm [shape: f32[8,784], index: 0, kind: input, shape index: {}]   ;;  %s8007_s1 = inlined_call_operand.hbm [shape: bf16[784,1536], index: 1, kind: input, shape index: {}]   ;;  %s8008_s2 = inlined_call_operand.hbm [shape: f32[1,1536], index: 2, kind: input, shape index: {}]   ;;  %s8009_s3 = inlined_call_operand.hbm [shape: bf16[1536,128], index: 3, kind: input, shape index: {}]   ;;  %s8010_s4 = inlined_call_operand.hbm [shape: f32[1,128], index: 4, kind: input, shape index: {}]   ;;  %s8011_s5 = inlined_call_operand.hbm [shape: f32[8,128], index: 5, kind: output, shape index: {}]  }
   0x1   :  { %11 = vsyncpa [#allocation6], 0 }
   0x2   :  { %12 = vsyncpa [#allocation9], 0 }
   0x3   :  { %13 = vsyncpa [#allocation4], 0  ;;  %s7771_s18 = smov [#allocation5]   ;;  %s7631_s22 = scalar_lea.hbm %s8007_s1, 75264 }
   0x4   :  { %s29_s19 = sshll.u32 %s7771_s18, 4  ;;  %p7632_p0 = scmp.ne.s32.totalorder %s8007_s1, %s7631_s22  ;;  %s30_s19 = int_to_ptr.vmem [resolvable:$true] %s29_s19 }
   0x5   :  { %p7635_p1 = scmp.lt.u32.totalorder %s7631_s22, %s8007_s1 }
   0x7   :  { %p7637_p2 = pnand %p7635_p1, %p7632_p0 }
   0x9   :  { %7640 = shalt.err (!%p7637_p2)
}
   0xa   :  { %s7641_s27 = scalar_lea.vmem %s30_s19, 75264  ;;  %p7646_p4 = scmp.lt.s32.totalorder %s30_s19, %s30_s19 }
   0xb   :  { %p7642_p3 = scmp.ne.s32.totalorder %s30_s19, %s7641_s27  ;;  %p7647_p5 = scmp.lt.s32.totalorder %s7641_s27, %s7641_s27 }
   0xd   :  { %p7648_p6 = por %p7647_p5, %p7646_p4 }
   0xf   :  { %p7649_p7 = pnand %p7648_p6, %p7642_p3 }
  0x11   :  { %7652 = shalt.err (!%p7649_p7)
}
  0x12   :  { %s7772_s28 = smov 768   ;;  %s7773_s29 = smov 48  }
  0x13   :  { %35 = dma.hbm_to_vmem [thread:$0]  %s8007_s1, 75264, %s30_s19, [#allocation6], %s7772_s28, %s7772_s28, %s7773_s29  }
  0x14   :  { %s7774_s7 = smov [#allocation8]   ;;  %s7653_s11 = scalar_lea.hbm %s8009_s3, 12288 }
  0x15   :  { %s51_s8 = sshll.u32 %s7774_s7, 4  ;;  %p7654_p8 = scmp.ne.s32.totalorder %s8009_s3, %s7653_s11  ;;  %s52_s8 = int_to_ptr.vmem [resolvable:$true] %s51_s8 }
  0x16   :  { %p7657_p9 = scmp.lt.u32.totalorder %s7653_s11, %s8009_s3 }
  0x18   :  { %p7659_p10 = pnand %p7657_p9, %p7654_p8 }
  0x1a   :  { %7662 = shalt.err (!%p7659_p10)
}
  0x1b   :  { %s7663_s16 = scalar_lea.vmem %s52_s8, 12288  ;;  %p7668_p12 = scmp.lt.s32.totalorder %s52_s8, %s52_s8 }
  0x1c   :  { %p7664_p11 = scmp.ne.s32.totalorder %s52_s8, %s7663_s16  ;;  %p7669_p13 = scmp.lt.s32.totalorder %s7663_s16, %s7663_s16 }
  0x1e   :  { %p7670_p0 = por %p7669_p13, %p7668_p12 }
  0x20   :  { %p7671_p1 = pnand %p7670_p0, %p7664_p11 }
  0x22   :  { %7674 = shalt.err (!%p7671_p1)
}
  0x23   :  { %s7775_s1 = smov 64   ;;  %s7776_s17 = smov 4  }
  0x24   :  { %57 = dma.hbm_to_vmem [thread:$0]  %s8009_s3, 12288, %s52_s8, [#allocation9], %s7775_s1, %s7775_s1, %s7776_s17  }
  0x25   :  { %s7777_s20 = smov [#allocation2]   ;;  %s7778_s22 = smov [#allocation7]  }
  0x26   :  { %s20_s21 = sshll.u32 %s7777_s20, 4  ;;  %s42_s23 = sshll.u32 %s7778_s22, 4  ;;  %s21_s21 = int_to_ptr.vmem [resolvable:$true] %s20_s21  ;;  %s43_s23 = int_to_ptr.vmem [resolvable:$true] %s42_s23 }
  0x27   :  { %s7675_s26 = scalar_lea.hbm %s8006_s0, 896 }
  0x28   :  { %p7676_p2 = scmp.ne.s32.totalorder %s8006_s0, %s7675_s26  ;;  %p7679_p3 = scmp.lt.u32.totalorder %s7675_s26, %s8006_s0 }
  0x2a   :  { %p7681_p4 = pnand %p7679_p3, %p7676_p2 }
  0x2c   :  { %7684 = shalt.err (!%p7681_p4)
}
  0x2d   :  { %s7685_s3 = scalar_lea.vmem %s21_s21, 896  ;;  %p7690_p6 = scmp.lt.s32.totalorder %s21_s21, %s21_s21 }
  0x2e   :  { %p7686_p5 = scmp.ne.s32.totalorder %s21_s21, %s7685_s3  ;;  %p7691_p7 = scmp.lt.s32.totalorder %s7685_s3, %s7685_s3 }
  0x30   :  { %p7692_p8 = por %p7691_p7, %p7690_p6 }
  0x32   :  { %p7693_p9 = pnand %p7692_p8, %p7686_p5 }
  0x34   :  { %7696 = shalt.err (!%p7693_p9)
}
  0x35   :  { %23 = dma.hbm_to_vmem [thread:$0]  %s8006_s0, 896, %s21_s21, [#allocation3]  }
  0x36   :  { %s7697_s10 = scalar_lea.hbm %s8008_s2, 192 }
  0x37   :  { %p7698_p10 = scmp.ne.s32.totalorder %s8008_s2, %s7697_s10  ;;  %p7701_p11 = scmp.lt.u32.totalorder %s7697_s10, %s8008_s2 }
  0x39   :  { %p7703_p12 = pnand %p7701_p11, %p7698_p10 }
  0x3b   :  { %7706 = shalt.err (!%p7703_p12)
}
  0x3c   :  { %s7707_s15 = scalar_lea.vmem %s43_s23, 192  ;;  %p7712_p0 = scmp.lt.s32.totalorder %s43_s23, %s43_s23 }
  0x3d   :  { %p7708_p13 = scmp.ne.s32.totalorder %s43_s23, %s7707_s15  ;;  %p7713_p1 = scmp.lt.s32.totalorder %s7707_s15, %s7707_s15 }
  0x3f   :  { %p7714_p2 = por %p7713_p1, %p7712_p0 }
  0x41   :  { %p7715_p3 = pnand %p7714_p2, %p7708_p13 }
  0x43   :  { %7718 = shalt.err (!%p7715_p3)
}
  0x44   :  { %45 = dma.hbm_to_vmem [thread:$0]  %s8008_s2, 192, %s43_s23, [#allocation6]  }
  0x45   :  { %s7779_s1 = smov [#allocation10]   ;;  %s7719_s20 = scalar_lea.hbm %s8010_s4, 16 }
  0x46   :  { %s64_s17 = sshll.u32 %s7779_s1, 4  ;;  %p7720_p4 = scmp.ne.s32.totalorder %s8010_s4, %s7719_s20  ;;  %s65_s17 = int_to_ptr.vmem [resolvable:$true] %s64_s17 }
  0x47   :  { %p7723_p5 = scmp.lt.u32.totalorder %s7719_s20, %s8010_s4 }
  0x49   :  { %p7725_p6 = pnand %p7723_p5, %p7720_p4 }
  0x4b   :  { %7728 = shalt.err (!%p7725_p6)
}
  0x4c   :  { %s7729_s26 = scalar_lea.vmem %s65_s17, 16  ;;  %s7733_s2 = scalar_lea.vmem %s65_s17, 32 }
  0x4d   :  { %p7730_p7 = scmp.ne.s32.totalorder %s65_s17, %s7729_s26  ;;  %p7734_p8 = scmp.lt.s32.totalorder %s65_s17, %s65_s17 }
  0x4e   :  { %p7735_p9 = scmp.lt.s32.totalorder %s7733_s2, %s7729_s26 }
  0x50   :  { %p7736_p10 = por %p7735_p9, %p7734_p8 }
  0x52   :  { %p7737_p11 = pnand %p7736_p10, %p7730_p7 }
  0x54   :  { %7740 = shalt.err (!%p7737_p11)
}
  0x55   :  { %67 = dma.hbm_to_vmem [thread:$0]  %s8010_s4, 16, %s65_s17, [#allocation9]  }
  0x56   :  { %7763 = dma.done.wait [#allocation3], 896  }
  0x57   :  { %7764 = vsyncadd [#allocation3], 4294966400 }
  0x58   :  { %7765 = dma.done.wait [#allocation6], 75456  }
  0x59   :  { %7766 = vsyncadd [#allocation6], 4294891840 }
  0x5a   :  { %7767 = dma.done.wait [#allocation9], 12304  }
  0x5b   :  { %7768 = vsyncadd [#allocation9], 4294954992  ;;  %v6653_v0 = vld [vmem:[#allocation5 + $0x4] ss:$48 sps:$4 sm:$0xff]   ;;  %v6655_v1 = vld [vmem:[#allocation5 + $0xc] ss:$48 sps:$4 sm:$0xff]  }
  0x5c   :  { %3694 = vmatprep.subr.bf16.mxu0 %v6653_v0  ;;  %v6657_v2 = vld [vmem:[#allocation5] ss:$48 sps:$4 sm:$0xff]   ;;  %v6658_v3 = vld [vmem:[#allocation5 + $0x8] ss:$48 sps:$4 sm:$0xff]   ;;  %3858 = vmatprep.subr.bf16.mxu1 %v6655_v1  ;;  %v6659_v4 = vld [vmem:[#allocation5 + $0x64] ss:$48 sps:$4 sm:$0xff]  }
  0x5d   :  { %3695 = vmatpush1.bf16.msra.mxu0 %v6657_v2  ;;  %3859 = vmatpush1.bf16.msra.mxu1 %v6658_v3  ;;  %v6661_v5 = vld [vmem:[#allocation5 + $0x6c] ss:$48 sps:$4 sm:$0xff]   ;;  %v6663_v6 = vld [vmem:[#allocation5 + $0x60] ss:$48 sps:$4 sm:$0xff]   ;;  %v6664_v7 = vld [vmem:[#allocation5 + $0x68] ss:$48 sps:$4 sm:$0xff]  }
  0x5e   :  { %3696 = vmatprep.subr.bf16.mxu0 %v6659_v4  ;;  %3860 = vmatprep.subr.bf16.mxu1 %v6661_v5  ;;  %v6665_v8 = vld [vmem:[#allocation5 + $0xc4] ss:$48 sps:$4 sm:$0xff]   ;;  %v6667_v9 = vld [vmem:[#allocation5 + $0xcc] ss:$48 sps:$4 sm:$0xff]   ;;  %v6669_v10 = vld [vmem:[#allocation5 + $0xc0] ss:$48 sps:$4 sm:$0xff]  }
  0x5f   :  { %v6670_v11 = vld [vmem:[#allocation5 + $0xc8] ss:$48 sps:$4 sm:$0xff]   ;;  %v6671_v12 = vld [vmem:[#allocation5 + $0x124] ss:$48 sps:$4 sm:$0xff]   ;;  %v6673_v13 = vld [vmem:[#allocation5 + $0x12c] ss:$48 sps:$4 sm:$0xff]  }
  0x60   :  { %v6675_v14 = vld [vmem:[#allocation5 + $0x120] ss:$48 sps:$4 sm:$0xff]   ;;  %v6676_v15 = vld [vmem:[#allocation5 + $0x128] ss:$48 sps:$4 sm:$0xff]   ;;  %v6677_v16 = vld [vmem:[#allocation5 + $0x184] ss:$48 sps:$4 sm:$0xff]  }
  0x61   :  { %3697 = vmatpush1.bf16.msra.mxu0 %v6663_v6  ;;  %3861 = vmatpush1.bf16.msra.mxu1 %v6664_v7  ;;  %v6679_v17 = vld [vmem:[#allocation5 + $0x18c] ss:$48 sps:$4 sm:$0xff]   ;;  %v6681_v18 = vld [vmem:[#allocation5 + $0x180] ss:$48 sps:$4 sm:$0xff]   ;;  %v6682_v19 = vld [vmem:[#allocation5 + $0x188] ss:$48 sps:$4 sm:$0xff]  }
  0x62   :  { %3698 = vmatprep.subr.bf16.mxu0 %v6665_v8  ;;  %3862 = vmatprep.subr.bf16.mxu1 %v6667_v9  ;;  %v6683_v20 = vld [vmem:[#allocation5 + $0x1e4] ss:$48 sps:$4 sm:$0xff]   ;;  %v6685_v21 = vld [vmem:[#allocation5 + $0x1ec] ss:$48 sps:$4 sm:$0xff]   ;;  %v6687_v22 = vld [vmem:[#allocation5 + $0x1e0] ss:$48 sps:$4 sm:$0xff]  }
  0x63   :  { %v6688_v23 = vld [vmem:[#allocation5 + $0x1e8] ss:$48 sps:$4 sm:$0xff]   ;;  %v6689_v24 = vld [vmem:[#allocation5 + $0x244] ss:$48 sps:$4 sm:$0xff]   ;;  %v6691_v25 = vld [vmem:[#allocation5 + $0x24c] ss:$48 sps:$4 sm:$0xff]  }
  0x64   :  { %v6693_v26 = vld [vmem:[#allocation5 + $0x240] ss:$48 sps:$4 sm:$0xff]   ;;  %v6694_v27 = vld [vmem:[#allocation5 + $0x248] ss:$48 sps:$4 sm:$0xff]   ;;  %v6695_v28 = vld [vmem:[#allocation5 + $0x2a4] ss:$48 sps:$4 sm:$0xff]  }
  0x65   :  { %3699 = vmatpush1.bf16.msra.mxu0 %v6669_v10  ;;  %3863 = vmatpush1.bf16.msra.mxu1 %v6670_v11  ;;  %v6697_v29 = vld [vmem:[#allocation5 + $0x2ac] ss:$48 sps:$4 sm:$0xff]   ;;  %v6699_v30 = vld [vmem:[#allocation5 + $0x2a0] ss:$48 sps:$4 sm:$0xff]   ;;  %v6700_v31 = vld [vmem:[#allocation5 + $0x2a8] ss:$48 sps:$4 sm:$0xff]  }
  0x66   :  { %3700 = vmatprep.subr.bf16.mxu0 %v6671_v12  ;;  %3864 = vmatprep.subr.bf16.mxu1 %v6673_v13  ;;  %v6701_v32 = vld [vmem:[#allocation5 + $0x304] ss:$48 sps:$4 sm:$0xff]   ;;  %v6703_v33 = vld [vmem:[#allocation5 + $0x30c] ss:$48 sps:$4 sm:$0xff]   ;;  %v6705_v34 = vld [vmem:[#allocation5 + $0x300] ss:$48 sps:$4 sm:$0xff]  }
  0x67   :  { %v6706_v35 = vld [vmem:[#allocation5 + $0x308] ss:$48 sps:$4 sm:$0xff]   ;;  %v6707_v36 = vld [vmem:[#allocation5 + $0x364] ss:$48 sps:$4 sm:$0xff]   ;;  %v6709_v37 = vld [vmem:[#allocation5 + $0x36c] ss:$48 sps:$4 sm:$0xff]  }
  0x68   :  { %v6711_v38 = vld [vmem:[#allocation5 + $0x360] ss:$48 sps:$4 sm:$0xff]   ;;  %v6712_v39 = vld [vmem:[#allocation5 + $0x368] ss:$48 sps:$4 sm:$0xff]   ;;  %v6713_v40 = vld [vmem:[#allocation5 + $0x3c4] ss:$48 sps:$4 sm:$0xff]  }
  0x69   :  { %3701 = vmatpush1.bf16.msra.mxu0 %v6675_v14  ;;  %3865 = vmatpush1.bf16.msra.mxu1 %v6676_v15  ;;  %v6715_v41 = vld [vmem:[#allocation5 + $0x3cc] ss:$48 sps:$4 sm:$0xff]   ;;  %v6717_v42 = vld [vmem:[#allocation5 + $0x3c0] ss:$48 sps:$4 sm:$0xff]   ;;  %v6718_v43 = vld [vmem:[#allocation5 + $0x3c8] ss:$48 sps:$4 sm:$0xff]  }
  0x6a   :  { %3702 = vmatprep.subr.bf16.mxu0 %v6677_v16  ;;  %3866 = vmatprep.subr.bf16.mxu1 %v6679_v17  ;;  %v6719_v44 = vld [vmem:[#allocation5 + $0x424] ss:$48 sps:$4 sm:$0xff]   ;;  %v6721_v45 = vld [vmem:[#allocation5 + $0x42c] ss:$48 sps:$4 sm:$0xff]   ;;  %v6723_v47 = vld [vmem:[#allocation5 + $0x420] ss:$48 sps:$4 sm:$0xff]  }
  0x6b   :  { %v85_v46 = vld [vmem:[#allocation2 + $0x8] sm:$0xff]  ;;  %v6724_v49 = vld [vmem:[#allocation5 + $0x428] ss:$48 sps:$4 sm:$0xff]   ;;  %v6727_v51 = vld [vmem:[#allocation5 + $0x48c] ss:$48 sps:$4 sm:$0xff]   ;;  %vm3690_vm0 = vcmask 130048  }
  0x6c   :  { %v7872_v48 = vpack.c.bf16 %v85_v46, %v85_v46  ;;  %v6725_v50 = vld [vmem:[#allocation5 + $0x484] ss:$48 sps:$4 sm:$0xff]   ;;  %v6729_v52 = vld [vmem:[#allocation5 + $0x480] ss:$48 sps:$4 sm:$0xff]   ;;  %v6730_v53 = vld [vmem:[#allocation5 + $0x488] ss:$48 sps:$4 sm:$0xff]  }
  0x6d   :  { %3703 = vmatpush1.bf16.msra.mxu0 %v6681_v18  ;;  %3867 = vmatpush1.bf16.msra.mxu1 %v6682_v19  ;;  %v6731_v54 = vld [vmem:[#allocation5 + $0x4e4] ss:$48 sps:$4 sm:$0xff]   ;;  %v6733_v55 = vld [vmem:[#allocation5 + $0x4ec] ss:$48 sps:$4 sm:$0xff]   ;;  %v6735_v56 = vld [vmem:[#allocation5 + $0x4e0] ss:$48 sps:$4 sm:$0xff]  }
  0x6e   :  { %3704 = vmatprep.subr.bf16.mxu0 %v6683_v20  ;;  %3868 = vmatprep.subr.bf16.mxu1 %v6685_v21  ;;  %v6736_v57 = vld [vmem:[#allocation5 + $0x4e8] ss:$48 sps:$4 sm:$0xff]   ;;  %v6737_v58 = vld [vmem:[#allocation5 + $0x544] ss:$48 sps:$4 sm:$0xff]   ;;  %v6739_v59 = vld [vmem:[#allocation5 + $0x54c] ss:$48 sps:$4 sm:$0xff]  }
  0x6f   :  { %3726 = vmatprep.mubr.bf16.mxu0 %v7872_v48  ;;  %3890 = vmatprep.mubr.bf16.mxu1 %v7872_v48  ;;  %v6741_v60 = vld [vmem:[#allocation5 + $0x540] ss:$48 sps:$4 sm:$0xff]   ;;  %v6742_v61 = vld [vmem:[#allocation5 + $0x548] ss:$48 sps:$4 sm:$0xff]   ;;  %v6743_v62 = vld [vmem:[#allocation5 + $0x5a4] ss:$48 sps:$4 sm:$0xff]  }
  0x70   :  { %v6745_v63 = vld [vmem:[#allocation5 + $0x5ac] ss:$48 sps:$4 sm:$0xff]   ;;  %v6747_v0 = vld [vmem:[#allocation5 + $0x5a0] ss:$48 sps:$4 sm:$0xff]   ;;  %v6748_v1 = vld [vmem:[#allocation5 + $0x5a8] ss:$48 sps:$4 sm:$0xff]  }
  0x71   :  { %3705 = vmatpush1.bf16.msra.mxu0 %v6687_v22  ;;  %3869 = vmatpush1.bf16.msra.mxu1 %v6688_v23  ;;  %v84_v2 = vld [vmem:[#allocation2] sm:$0xff]  ;;  %v6751_v3 = vld [vmem:[#allocation5 + $0x604] ss:$48 sps:$4 sm:$0xff]   ;;  %v6749_v6 = vld [vmem:[#allocation5 + $0x600] ss:$48 sps:$4 sm:$0xff]   ;;  %s7781_s4 = smov [#allocation11]  }
  0x72   :  { %3706 = vmatprep.subr.bf16.mxu0 %v6689_v24  ;;  %3870 = vmatprep.subr.bf16.mxu1 %v6691_v25  ;;  %v6754_v4 = vld [vmem:[#allocation5 + $0x60c] ss:$48 sps:$4 sm:$0xff]   ;;  %v7876_v5 = vpack.c.bf16 %v84_v2, %v84_v2  ;;  %v6752_v7 = vld [vmem:[#allocation5 + $0x608] ss:$48 sps:$4 sm:$0xff]   ;;  %v6757_v8 = vld [vmem:[#allocation5 + $0x664] ss:$48 sps:$4 sm:$0xff]  }
  0x73   :  { %v6760_v9 = vld [vmem:[#allocation5 + $0x66c] ss:$48 sps:$4 sm:$0xff]   ;;  %v6755_v10 = vld [vmem:[#allocation5 + $0x660] ss:$48 sps:$4 sm:$0xff]   ;;  %v6758_v11 = vld [vmem:[#allocation5 + $0x668] ss:$48 sps:$4 sm:$0xff]  }
  0x74   :  { %v6763_v12 = vld [vmem:[#allocation5 + $0x6c4] ss:$48 sps:$4 sm:$0xff]   ;;  %v6766_v13 = vld [vmem:[#allocation5 + $0x6cc] ss:$48 sps:$4 sm:$0xff]   ;;  %v6761_v14 = vld [vmem:[#allocation5 + $0x6c0] ss:$48 sps:$4 sm:$0xff]  }
  0x75   :  { %3707 = vmatpush1.bf16.msra.mxu0 %v6693_v26  ;;  %3871 = vmatpush1.bf16.msra.mxu1 %v6694_v27  ;;  %v6764_v15 = vld [vmem:[#allocation5 + $0x6c8] ss:$48 sps:$4 sm:$0xff]   ;;  %v6769_v16 = vld [vmem:[#allocation5 + $0x724] ss:$48 sps:$4 sm:$0xff]   ;;  %v6772_v17 = vld [vmem:[#allocation5 + $0x72c] ss:$48 sps:$4 sm:$0xff]  }
  0x76   :  { %3708 = vmatprep.subr.bf16.mxu0 %v6695_v28  ;;  %3872 = vmatprep.subr.bf16.mxu1 %v6697_v29  ;;  %v6767_v18 = vld [vmem:[#allocation5 + $0x720] ss:$48 sps:$4 sm:$0xff]   ;;  %v6770_v19 = vld [vmem:[#allocation5 + $0x728] ss:$48 sps:$4 sm:$0xff]   ;;  %v6775_v20 = vld [vmem:[#allocation5 + $0x784] ss:$48 sps:$4 sm:$0xff]  }
  0x77   :  { %v6778_v21 = vld [vmem:[#allocation5 + $0x78c] ss:$48 sps:$4 sm:$0xff]   ;;  %v6773_v22 = vld [vmem:[#allocation5 + $0x780] ss:$48 sps:$4 sm:$0xff]   ;;  %v6776_v23 = vld [vmem:[#allocation5 + $0x788] ss:$48 sps:$4 sm:$0xff]  }
  0x78   :  { %v6781_v24 = vld [vmem:[#allocation5 + $0x7e4] ss:$48 sps:$4 sm:$0xff]   ;;  %v6784_v25 = vld [vmem:[#allocation5 + $0x7ec] ss:$48 sps:$4 sm:$0xff]   ;;  %v6779_v26 = vld [vmem:[#allocation5 + $0x7e0] ss:$48 sps:$4 sm:$0xff]  }
  0x79   :  { %3709 = vmatpush1.bf16.msra.mxu0 %v6699_v30  ;;  %3873 = vmatpush1.bf16.msra.mxu1 %v6700_v31  ;;  %v6782_v27 = vld [vmem:[#allocation5 + $0x7e8] ss:$48 sps:$4 sm:$0xff]   ;;  %v6787_v28 = vld [vmem:[#allocation5 + $0x844] ss:$48 sps:$4 sm:$0xff]   ;;  %v6790_v29 = vld [vmem:[#allocation5 + $0x84c] ss:$48 sps:$4 sm:$0xff]  }
  0x7a   :  { %3710 = vmatprep.subr.bf16.mxu0 %v6701_v32  ;;  %3874 = vmatprep.subr.bf16.mxu1 %v6703_v33  ;;  %v87_v30 = vld [vmem:[#allocation2 + $0x18] sm:$0xff]  ;;  %v6788_v33 = vld [vmem:[#allocation5 + $0x848] ss:$48 sps:$4 sm:$0xff]   ;;  %s5724_s28 = sshll.u32 %s7781_s4, 4  ;;  %s5725_s28 = int_to_ptr.vmem [resolvable:$true] %s5724_s28 }
  0x7b   :  { %v6785_v31 = vld [vmem:[#allocation5 + $0x840] ss:$48 sps:$4 sm:$0xff]   ;;  %v7880_v32 = vpack.c.bf16 %v87_v30, %v87_v30  ;;  %v6811_v46 = vld [vmem:[#allocation5 + $0x9c4] ss:$48 sps:$4 sm:$0xff]   ;;  %v6836_v2 = vld [vmem:[#allocation5 + $0xb48] ss:$48 sps:$4 sm:$0xff]   ;;  %p7746_p13 = scmp.lt.s32.totalorder %s5725_s28, %s5725_s28 }
  0x7c   :  { %v6869_v30 = vld [vmem:[#allocation5 + $0xd80] ss:$48 sps:$4 sm:$0xff]   ;;  %s7741_s29 = scalar_lea.vmem %s5725_s28, 128 }
  0x7d   :  { %3711 = vmatpush1.bf16.msra.mxu0 %v6705_v34  ;;  %3875 = vmatpush1.bf16.msra.mxu1 %v6706_v35  ;;  %v6793_v34 = vld [vmem:[#allocation5 + $0x8a4] ss:$48 sps:$4 sm:$0xff]   ;;  %v6796_v35 = vld [vmem:[#allocation5 + $0x8ac] ss:$48 sps:$4 sm:$0xff]   ;;  %p7742_p12 = scmp.ne.s32.totalorder %s5725_s28, %s7741_s29  ;;  %p7747_p0 = scmp.lt.s32.totalorder %s7741_s29, %s7741_s29 }
  0x7e   :  { %3712 = vmatprep.subr.bf16.mxu0 %v6707_v36  ;;  %3876 = vmatprep.subr.bf16.mxu1 %v6709_v37  ;;  %v6791_v36 = vld [vmem:[#allocation5 + $0x8a0] ss:$48 sps:$4 sm:$0xff]   ;;  %v6794_v37 = vld [vmem:[#allocation5 + $0x8a8] ss:$48 sps:$4 sm:$0xff]  }
  0x7f   :  { %p7748_p1 = por %p7747_p0, %p7746_p13 }
  0x81   :  { %3713 = vmatpush1.bf16.msra.mxu0 %v6711_v38  ;;  %3877 = vmatpush1.bf16.msra.mxu1 %v6712_v39  ;;  %v6799_v38 = vld [vmem:[#allocation5 + $0x904] ss:$48 sps:$4 sm:$0xff]   ;;  %v6802_v39 = vld [vmem:[#allocation5 + $0x90c] ss:$48 sps:$4 sm:$0xff]   ;;  %p7749_p2 = pnand %p7748_p1, %p7742_p12 }
  0x82   :  { %3714 = vmatprep.subr.bf16.mxu0 %v6713_v40  ;;  %3878 = vmatprep.subr.bf16.mxu1 %v6715_v41  ;;  %v6797_v40 = vld [vmem:[#allocation5 + $0x900] ss:$48 sps:$4 sm:$0xff]   ;;  %v6800_v41 = vld [vmem:[#allocation5 + $0x908] ss:$48 sps:$4 sm:$0xff]  }
  0x85   :  { %3715 = vmatpush1.bf16.msra.mxu0 %v6717_v42  ;;  %3879 = vmatpush1.bf16.msra.mxu1 %v6718_v43  ;;  %v6805_v42 = vld [vmem:[#allocation5 + $0x964] ss:$48 sps:$4 sm:$0xff]   ;;  %v6808_v43 = vld [vmem:[#allocation5 + $0x96c] ss:$48 sps:$4 sm:$0xff]  }
  0x86   :  { %3716 = vmatprep.subr.bf16.mxu0 %v6719_v44  ;;  %3880 = vmatprep.subr.bf16.mxu1 %v6721_v45  ;;  %v6803_v44 = vld [vmem:[#allocation5 + $0x960] ss:$48 sps:$4 sm:$0xff]   ;;  %v6806_v45 = vld [vmem:[#allocation5 + $0x968] ss:$48 sps:$4 sm:$0xff]  }
  0x89   :  { %3717 = vmatpush1.bf16.msra.mxu0 %v6723_v47  ;;  %3881 = vmatpush1.bf16.msra.mxu1 %v6724_v49  ;;  %v6814_v47 = vld [vmem:[#allocation5 + $0x9cc] ss:$48 sps:$4 sm:$0xff]   ;;  %v6809_v49 = vld [vmem:[#allocation5 + $0x9c0] ss:$48 sps:$4 sm:$0xff]  }
  0x8a   :  { %3718 = vmatprep.subr.bf16.mxu0 %v6725_v50  ;;  %3882 = vmatprep.subr.bf16.mxu1 %v6727_v51  ;;  %v6812_v50 = vld [vmem:[#allocation5 + $0x9c8] ss:$48 sps:$4 sm:$0xff]   ;;  %v6817_v51 = vld [vmem:[#allocation5 + $0xa24] ss:$48 sps:$4 sm:$0xff]  }
  0x8d   :  { %3719 = vmatpush1.bf16.msra.mxu0 %v6729_v52  ;;  %3883 = vmatpush1.bf16.msra.mxu1 %v6730_v53  ;;  %v6820_v52 = vld [vmem:[#allocation5 + $0xa2c] ss:$48 sps:$4 sm:$0xff]   ;;  %v6815_v53 = vld [vmem:[#allocation5 + $0xa20] ss:$48 sps:$4 sm:$0xff]  }
  0x8e   :  { %3720 = vmatprep.subr.bf16.mxu0 %v6731_v54  ;;  %3884 = vmatprep.subr.bf16.mxu1 %v6733_v55  ;;  %v6818_v54 = vld [vmem:[#allocation5 + $0xa28] ss:$48 sps:$4 sm:$0xff]   ;;  %v6823_v55 = vld [vmem:[#allocation5 + $0xa84] ss:$48 sps:$4 sm:$0xff]  }
  0x91   :  { %3721 = vmatpush1.bf16.msra.mxu0 %v6735_v56  ;;  %3885 = vmatpush1.bf16.msra.mxu1 %v6736_v57  ;;  %v6826_v56 = vld [vmem:[#allocation5 + $0xa8c] ss:$48 sps:$4 sm:$0xff]   ;;  %v6821_v57 = vld [vmem:[#allocation5 + $0xa80] ss:$48 sps:$4 sm:$0xff]  }
  0x92   :  { %3722 = vmatprep.subr.bf16.mxu0 %v6737_v58  ;;  %3886 = vmatprep.subr.bf16.mxu1 %v6739_v59  ;;  %v6824_v58 = vld [vmem:[#allocation5 + $0xa88] ss:$48 sps:$4 sm:$0xff]   ;;  %v6829_v59 = vld [vmem:[#allocation5 + $0xae4] ss:$48 sps:$4 sm:$0xff]  }
  0x95   :  { %3723 = vmatpush1.bf16.msra.mxu0 %v6741_v60  ;;  %3887 = vmatpush1.bf16.msra.mxu1 %v6742_v61  ;;  %v6832_v60 = vld [vmem:[#allocation5 + $0xaec] ss:$48 sps:$4 sm:$0xff]   ;;  %v6827_v61 = vld [vmem:[#allocation5 + $0xae0] ss:$48 sps:$4 sm:$0xff]  }
  0x96   :  { %3724 = vmatprep.subr.bf16.mxu0 %v6743_v62  ;;  %3888 = vmatprep.subr.bf16.mxu1 %v6745_v63  ;;  %v6830_v62 = vld [vmem:[#allocation5 + $0xae8] ss:$48 sps:$4 sm:$0xff]   ;;  %v6835_v63 = vld [vmem:[#allocation5 + $0xb44] ss:$48 sps:$4 sm:$0xff]  }
  0x99   :  { %3725 = vmatpush1.bf16.msra.mxu0 %v6747_v0  ;;  %3889 = vmatpush1.bf16.msra.mxu1 %v6748_v1  ;;  %v6838_v0 = vld [vmem:[#allocation5 + $0xb4c] ss:$48 sps:$4 sm:$0xff]   ;;  %v6833_v1 = vld [vmem:[#allocation5 + $0xb40] ss:$48 sps:$4 sm:$0xff]  }
  0x9a   :  { %3735 = vmatprep.subr.bf16.mxu0 %v6751_v3  ;;  %3899 = vmatprep.subr.bf16.mxu1 %v6754_v4  ;;  %v6841_v3 = vld [vmem:[#allocation5 + $0xba4] ss:$48 sps:$4 sm:$0xff]   ;;  %v6844_v4 = vld [vmem:[#allocation5 + $0xbac] ss:$48 sps:$4 sm:$0xff]  }
  0x9c   :  { %3727 = vmatmul.mubr.bf16.vlgmr.msra.gmra.mrb[0].mxu0 %v7876_v5  ;;  %3891 = vmatmul.mubr.bf16.vlgmr.msra.gmra.mrb[0].mxu1 %v7876_v5 }
  0x9d   :  { %3736 = vmatpush1.bf16.msra.mxu0 %v6749_v6  ;;  %3900 = vmatpush1.bf16.msra.mxu1 %v6752_v7  ;;  %v6839_v6 = vld [vmem:[#allocation5 + $0xba0] ss:$48 sps:$4 sm:$0xff]   ;;  %v6842_v7 = vld [vmem:[#allocation5 + $0xba8] ss:$48 sps:$4 sm:$0xff]  }
  0x9e   :  { %3737 = vmatprep.subr.bf16.mxu0 %v6757_v8  ;;  %3901 = vmatprep.subr.bf16.mxu1 %v6760_v9  ;;  %v6847_v8 = vld [vmem:[#allocation5 + $0xc04] ss:$48 sps:$4 sm:$0xff]   ;;  %v86_v9 = vld [vmem:[#allocation2 + $0x10] sm:$0xff] }
  0x9f   :  { %3767 = vmatprep.mubr.bf16.mxu0 %v7880_v32  ;;  %3931 = vmatprep.mubr.bf16.mxu1 %v7880_v32 }
  0xa1   :  { %3738 = vmatpush1.bf16.msra.mxu0 %v6755_v10  ;;  %3902 = vmatpush1.bf16.msra.mxu1 %v6758_v11  ;;  %v6850_v10 = vld [vmem:[#allocation5 + $0xc0c] ss:$48 sps:$4 sm:$0xff]   ;;  %v6845_v11 = vld [vmem:[#allocation5 + $0xc00] ss:$48 sps:$4 sm:$0xff]  }
  0xa2   :  { %3739 = vmatprep.subr.bf16.mxu0 %v6763_v12  ;;  %3903 = vmatprep.subr.bf16.mxu1 %v6766_v13  ;;  %v7884_v12 = vpack.c.bf16 %v86_v9, %v86_v9  ;;  %v6848_v13 = vld [vmem:[#allocation5 + $0xc08] ss:$48 sps:$4 sm:$0xff]   ;;  %v6929_v9 = vld [vmem:[#allocation5 + $0x1140] ss:$48 sps:$4 sm:$0xff]  }
  0xa5   :  { %3740 = vmatpush1.bf16.msra.mxu0 %v6761_v14  ;;  %3904 = vmatpush1.bf16.msra.mxu1 %v6764_v15  ;;  %v6853_v14 = vld [vmem:[#allocation5 + $0xc64] ss:$48 sps:$4 sm:$0xff]   ;;  %v6856_v15 = vld [vmem:[#allocation5 + $0xc6c] ss:$48 sps:$4 sm:$0xff]  }
  0xa6   :  { %3741 = vmatprep.subr.bf16.mxu0 %v6769_v16  ;;  %3905 = vmatprep.subr.bf16.mxu1 %v6772_v17  ;;  %v89_v16 = vld [vmem:[#allocation2 + $0x28] sm:$0xff] }
  0xa7   :  { %v7886_v17 = vpack.c.bf16 %v89_v16, %v89_v16  ;;  %v88_v16 = vld [vmem:[#allocation2 + $0x20] sm:$0xff] }
  0xa9   :  { %3742 = vmatpush1.bf16.msra.mxu0 %v6767_v18  ;;  %3906 = vmatpush1.bf16.msra.mxu1 %v6770_v19  ;;  %v6851_v18 = vld [vmem:[#allocation5 + $0xc60] ss:$48 sps:$4 sm:$0xff]   ;;  %v6854_v19 = vld [vmem:[#allocation5 + $0xc68] ss:$48 sps:$4 sm:$0xff]  }
  0xaa   :  { %3743 = vmatprep.subr.bf16.mxu0 %v6775_v20  ;;  %3907 = vmatprep.subr.bf16.mxu1 %v6778_v21  ;;  %v6859_v20 = vld [vmem:[#allocation5 + $0xcc4] ss:$48 sps:$4 sm:$0xff]   ;;  %v6862_v21 = vld [vmem:[#allocation5 + $0xccc] ss:$48 sps:$4 sm:$0xff]  }
  0xad   :  { %3744 = vmatpush1.bf16.msra.mxu0 %v6773_v22  ;;  %3908 = vmatpush1.bf16.msra.mxu1 %v6776_v23  ;;  %v6857_v22 = vld [vmem:[#allocation5 + $0xcc0] ss:$48 sps:$4 sm:$0xff]   ;;  %v6860_v23 = vld [vmem:[#allocation5 + $0xcc8] ss:$48 sps:$4 sm:$0xff]  }
  0xae   :  { %3745 = vmatprep.subr.bf16.mxu0 %v6781_v24  ;;  %3909 = vmatprep.subr.bf16.mxu1 %v6784_v25  ;;  %v6865_v24 = vld [vmem:[#allocation5 + $0xd24] ss:$48 sps:$4 sm:$0xff]   ;;  %v6868_v25 = vld [vmem:[#allocation5 + $0xd2c] ss:$48 sps:$4 sm:$0xff]  }
  0xb1   :  { %3746 = vmatpush1.bf16.msra.mxu0 %v6779_v26  ;;  %3910 = vmatpush1.bf16.msra.mxu1 %v6782_v27  ;;  %v6863_v26 = vld [vmem:[#allocation5 + $0xd20] ss:$48 sps:$4 sm:$0xff]   ;;  %v6866_v27 = vld [vmem:[#allocation5 + $0xd28] ss:$48 sps:$4 sm:$0xff]  }
  0xb2   :  { %3747 = vmatprep.subr.bf16.mxu0 %v6787_v28  ;;  %3911 = vmatprep.subr.bf16.mxu1 %v6790_v29  ;;  %v6871_v28 = vld [vmem:[#allocation5 + $0xd84] ss:$48 sps:$4 sm:$0xff]   ;;  %v6874_v29 = vld [vmem:[#allocation5 + $0xd8c] ss:$48 sps:$4 sm:$0xff]  }
  0xb5   :  { %3748 = vmatpush1.bf16.msra.mxu0 %v6785_v31  ;;  %3912 = vmatpush1.bf16.msra.mxu1 %v6788_v33  ;;  %v6872_v31 = vld [vmem:[#allocation5 + $0xd88] ss:$48 sps:$4 sm:$0xff]   ;;  %v6877_v33 = vld [vmem:[#allocation5 + $0xde4] ss:$48 sps:$4 sm:$0xff]  }
  0xb6   :  { %3749 = vmatprep.subr.bf16.mxu0 %v6793_v34  ;;  %3913 = vmatprep.subr.bf16.mxu1 %v6796_v35  ;;  %v6880_v34 = vld [vmem:[#allocation5 + $0xdec] ss:$48 sps:$4 sm:$0xff]   ;;  %v6875_v35 = vld [vmem:[#allocation5 + $0xde0] ss:$48 sps:$4 sm:$0xff]  }
  0xb9   :  { %3750 = vmatpush1.bf16.msra.mxu0 %v6791_v36  ;;  %3914 = vmatpush1.bf16.msra.mxu1 %v6794_v37  ;;  %v6878_v36 = vld [vmem:[#allocation5 + $0xde8] ss:$48 sps:$4 sm:$0xff]   ;;  %v6883_v37 = vld [vmem:[#allocation5 + $0xe44] ss:$48 sps:$4 sm:$0xff]  }
  0xba   :  { %3751 = vmatprep.subr.bf16.mxu0 %v6799_v38  ;;  %3915 = vmatprep.subr.bf16.mxu1 %v6802_v39  ;;  %v6886_v38 = vld [vmem:[#allocation5 + $0xe4c] ss:$48 sps:$4 sm:$0xff]   ;;  %v6881_v39 = vld [vmem:[#allocation5 + $0xe40] ss:$48 sps:$4 sm:$0xff]  }
  0xbd   :  { %3752 = vmatpush1.bf16.msra.mxu0 %v6797_v40  ;;  %3916 = vmatpush1.bf16.msra.mxu1 %v6800_v41  ;;  %v6884_v40 = vld [vmem:[#allocation5 + $0xe48] ss:$48 sps:$4 sm:$0xff]   ;;  %v6889_v41 = vld [vmem:[#allocation5 + $0xea4] ss:$48 sps:$4 sm:$0xff]  }
  0xbe   :  { %3753 = vmatprep.subr.bf16.mxu0 %v6805_v42  ;;  %3917 = vmatprep.subr.bf16.mxu1 %v6808_v43  ;;  %v6892_v42 = vld [vmem:[#allocation5 + $0xeac] ss:$48 sps:$4 sm:$0xff]   ;;  %v6887_v43 = vld [vmem:[#allocation5 + $0xea0] ss:$48 sps:$4 sm:$0xff]  }
  0xc1   :  { %3754 = vmatpush1.bf16.msra.mxu0 %v6803_v44  ;;  %3918 = vmatpush1.bf16.msra.mxu1 %v6806_v45  ;;  %v6890_v44 = vld [vmem:[#allocation5 + $0xea8] ss:$48 sps:$4 sm:$0xff]   ;;  %v6895_v45 = vld [vmem:[#allocation5 + $0xf04] ss:$48 sps:$4 sm:$0xff]  }
  0xc2   :  { %3755 = vmatprep.subr.bf16.mxu0 %v6811_v46  ;;  %3919 = vmatprep.subr.bf16.mxu1 %v6814_v47  ;;  %v6898_v46 = vld [vmem:[#allocation5 + $0xf0c] ss:$48 sps:$4 sm:$0xff]   ;;  %v6893_v47 = vld [vmem:[#allocation5 + $0xf00] ss:$48 sps:$4 sm:$0xff]  }
  0xc5   :  { %3756 = vmatpush1.bf16.msra.mxu0 %v6809_v49  ;;  %3920 = vmatpush1.bf16.msra.mxu1 %v6812_v50  ;;  %v6896_v49 = vld [vmem:[#allocation5 + $0xf08] ss:$48 sps:$4 sm:$0xff]   ;;  %v6901_v50 = vld [vmem:[#allocation5 + $0xf64] ss:$48 sps:$4 sm:$0xff]  }
  0xc6   :  { %3757 = vmatprep.subr.bf16.mxu0 %v6817_v51  ;;  %3921 = vmatprep.subr.bf16.mxu1 %v6820_v52  ;;  %v6904_v51 = vld [vmem:[#allocation5 + $0xf6c] ss:$48 sps:$4 sm:$0xff]   ;;  %v6899_v52 = vld [vmem:[#allocation5 + $0xf60] ss:$48 sps:$4 sm:$0xff]  }
  0xc9   :  { %3758 = vmatpush1.bf16.msra.mxu0 %v6815_v53  ;;  %3922 = vmatpush1.bf16.msra.mxu1 %v6818_v54  ;;  %v6902_v53 = vld [vmem:[#allocation5 + $0xf68] ss:$48 sps:$4 sm:$0xff]   ;;  %v6907_v54 = vld [vmem:[#allocation5 + $0xfc4] ss:$48 sps:$4 sm:$0xff]  }
  0xca   :  { %3759 = vmatprep.subr.bf16.mxu0 %v6823_v55  ;;  %3923 = vmatprep.subr.bf16.mxu1 %v6826_v56  ;;  %v6910_v55 = vld [vmem:[#allocation5 + $0xfcc] ss:$48 sps:$4 sm:$0xff]   ;;  %v6905_v56 = vld [vmem:[#allocation5 + $0xfc0] ss:$48 sps:$4 sm:$0xff]  }
  0xcd   :  { %3760 = vmatpush1.bf16.msra.mxu0 %v6821_v57  ;;  %3924 = vmatpush1.bf16.msra.mxu1 %v6824_v58  ;;  %v6908_v57 = vld [vmem:[#allocation5 + $0xfc8] ss:$48 sps:$4 sm:$0xff]   ;;  %v6913_v58 = vld [vmem:[#allocation5 + $0x1024] ss:$48 sps:$4 sm:$0xff]  }
  0xce   :  { %3761 = vmatprep.subr.bf16.mxu0 %v6829_v59  ;;  %3925 = vmatprep.subr.bf16.mxu1 %v6832_v60  ;;  %v6916_v59 = vld [vmem:[#allocation5 + $0x102c] ss:$48 sps:$4 sm:$0xff]   ;;  %v6911_v60 = vld [vmem:[#allocation5 + $0x1020] ss:$48 sps:$4 sm:$0xff]  }
  0xd1   :  { %3762 = vmatpush1.bf16.msra.mxu0 %v6827_v61  ;;  %3926 = vmatpush1.bf16.msra.mxu1 %v6830_v62  ;;  %v6914_v61 = vld [vmem:[#allocation5 + $0x1028] ss:$48 sps:$4 sm:$0xff]   ;;  %v6919_v62 = vld [vmem:[#allocation5 + $0x1084] ss:$48 sps:$4 sm:$0xff]  }
  0xd2   :  { %3763 = vmatprep.subr.bf16.mxu0 %v6835_v63  ;;  %3927 = vmatprep.subr.bf16.mxu1 %v6838_v0  ;;  %v6922_v63 = vld [vmem:[#allocation5 + $0x108c] ss:$48 sps:$4 sm:$0xff]   ;;  %v6917_v0 = vld [vmem:[#allocation5 + $0x1080] ss:$48 sps:$4 sm:$0xff]  }
  0xd5   :  { %3764 = vmatpush1.bf16.msra.mxu0 %v6833_v1  ;;  %3928 = vmatpush1.bf16.msra.mxu1 %v6836_v2  ;;  %v6920_v1 = vld [vmem:[#allocation5 + $0x1088] ss:$48 sps:$4 sm:$0xff]   ;;  %v6925_v2 = vld [vmem:[#allocation5 + $0x10e4] ss:$48 sps:$4 sm:$0xff]  }
  0xd6   :  { %3765 = vmatprep.subr.bf16.mxu0 %v6841_v3  ;;  %3929 = vmatprep.subr.bf16.mxu1 %v6844_v4  ;;  %v6928_v3 = vld [vmem:[#allocation5 + $0x10ec] ss:$48 sps:$4 sm:$0xff]   ;;  %v6923_v4 = vld [vmem:[#allocation5 + $0x10e0] ss:$48 sps:$4 sm:$0xff]  }
  0xd9   :  { %3766 = vmatpush1.bf16.msra.mxu0 %v6839_v6  ;;  %3930 = vmatpush1.bf16.msra.mxu1 %v6842_v7  ;;  %v6926_v6 = vld [vmem:[#allocation5 + $0x10e8] ss:$48 sps:$4 sm:$0xff]   ;;  %v6931_v7 = vld [vmem:[#allocation5 + $0x1144] ss:$48 sps:$4 sm:$0xff]  }
  0xda   :  { %3776 = vmatprep.subr.bf16.mxu0 %v6847_v8  ;;  %3940 = vmatprep.subr.bf16.mxu1 %v6850_v10  ;;  %v6934_v8 = vld [vmem:[#allocation5 + $0x114c] ss:$48 sps:$4 sm:$0xff]   ;;  %v6932_v10 = vld [vmem:[#allocation5 + $0x1148] ss:$48 sps:$4 sm:$0xff]  }
  0xdc   :  { %3768 = vmatmul.mubr.bf16.vlgmr.msra.gmra.mrb[0].mxu0 %v7884_v12  ;;  %3932 = vmatmul.mubr.bf16.vlgmr.msra.gmra.mrb[0].mxu1 %v7884_v12 }
  0xdd   :  { %3777 = vmatpush1.bf16.msra.mxu0 %v6845_v11  ;;  %3941 = vmatpush1.bf16.msra.mxu1 %v6848_v13  ;;  %v6937_v11 = vld [vmem:[#allocation5 + $0x11a4] ss:$48 sps:$4 sm:$0xff]   ;;  %v6940_v13 = vld [vmem:[#allocation5 + $0x11ac] ss:$48 sps:$4 sm:$0xff]  }
  0xde   :  { %3778 = vmatprep.subr.bf16.mxu0 %v6853_v14  ;;  %3942 = vmatprep.subr.bf16.mxu1 %v6856_v15  ;;  %v6935_v14 = vld [vmem:[#allocation5 + $0x11a0] ss:$48 sps:$4 sm:$0xff]   ;;  %v6938_v15 = vld [vmem:[#allocation5 + $0x11a8] ss:$48 sps:$4 sm:$0xff]  }
  0xdf   :  { %3808 = vmatprep.mubr.bf16.mxu0 %v7886_v17  ;;  %3972 = vmatprep.mubr.bf16.mxu1 %v7886_v17 }
  0xe1   :  { %3779 = vmatpush1.bf16.msra.mxu0 %v6851_v18  ;;  %3943 = vmatpush1.bf16.msra.mxu1 %v6854_v19  ;;  %v6943_v18 = vld [vmem:[#allocation5 + $0x1204] ss:$48 sps:$4 sm:$0xff]   ;;  %v6946_v19 = vld [vmem:[#allocation5 + $0x120c] ss:$48 sps:$4 sm:$0xff]  }
  0xe2   :  { %3780 = vmatprep.subr.bf16.mxu0 %v6859_v20  ;;  %3944 = vmatprep.subr.bf16.mxu1 %v6862_v21  ;;  %v7892_v20 = vpack.c.bf16 %v88_v16, %v88_v16  ;;  %v6941_v21 = vld [vmem:[#allocation5 + $0x1200] ss:$48 sps:$4 sm:$0xff]  }
  0xe3   :  { %v7019_v16 = vld [vmem:[#allocation5 + $0x490] ss:$48 sps:$4 sm:$0xff]  }
  0xe5   :  { %3781 = vmatpush1.bf16.msra.mxu0 %v6857_v22  ;;  %3945 = vmatpush1.bf16.msra.mxu1 %v6860_v23  ;;  %v6944_v22 = vld [vmem:[#allocation5 + $0x1208] ss:$48 sps:$4 sm:$0xff]   ;;  %v6949_v23 = vld [vmem:[#allocation5 + $0x14] ss:$48 sps:$4 sm:$0xff]  }
  0xe6   :  { %3782 = vmatprep.subr.bf16.mxu0 %v6865_v24  ;;  %3946 = vmatprep.subr.bf16.mxu1 %v6868_v25  ;;  %v6952_v24 = vld [vmem:[#allocation5 + $0x1c] ss:$48 sps:$4 sm:$0xff]   ;;  %v7780_v25 = vmov 0  }
  0xe9   :  { %3783 = vmatpush1.bf16.msra.mxu0 %v6863_v26  ;;  %3947 = vmatpush1.bf16.msra.mxu1 %v6866_v27  ;;  %v90_v26 = vld [vmem:[#allocation2 + $0x30] sm:$0xff]  ;;  %v6947_v27 = vld [vmem:[#allocation5 + $0x10] ss:$48 sps:$4 sm:$0xff]  }
  0xea   :  { %3784 = vmatprep.subr.bf16.mxu0 %v6871_v28  ;;  %3948 = vmatprep.subr.bf16.mxu1 %v6874_v29  ;;  %v7898_v28 = vpack.c.bf16 %v90_v26, %v90_v26  ;;  %v6950_v29 = vld [vmem:[#allocation5 + $0x18] ss:$48 sps:$4 sm:$0xff]   ;;  %v7036_v26 = vld [vmem:[#allocation5 + $0x55c] ss:$48 sps:$4 sm:$0xff]  }
  0xed   :  { %3785 = vmatpush1.bf16.msra.mxu0 %v6869_v30  ;;  %3949 = vmatpush1.bf16.msra.mxu1 %v6872_v31  ;;  %v6955_v30 = vld [vmem:[#allocation5 + $0x74] ss:$48 sps:$4 sm:$0xff]   ;;  %v6958_v31 = vld [vmem:[#allocation5 + $0x7c] ss:$48 sps:$4 sm:$0xff]  }
  0xee   :  { %3786 = vmatprep.subr.bf16.mxu0 %v6877_v33  ;;  %3950 = vmatprep.subr.bf16.mxu1 %v6880_v34  ;;  %v6953_v33 = vld [vmem:[#allocation5 + $0x70] ss:$48 sps:$4 sm:$0xff]   ;;  %v6956_v34 = vld [vmem:[#allocation5 + $0x78] ss:$48 sps:$4 sm:$0xff]  }
  0xf1   :  { %3787 = vmatpush1.bf16.msra.mxu0 %v6875_v35  ;;  %3951 = vmatpush1.bf16.msra.mxu1 %v6878_v36  ;;  %v6961_v35 = vld [vmem:[#allocation5 + $0xd4] ss:$48 sps:$4 sm:$0xff]   ;;  %v6964_v36 = vld [vmem:[#allocation5 + $0xdc] ss:$48 sps:$4 sm:$0xff]  }
  0xf2   :  { %3788 = vmatprep.subr.bf16.mxu0 %v6883_v37  ;;  %3952 = vmatprep.subr.bf16.mxu1 %v6886_v38  ;;  %v6959_v37 = vld [vmem:[#allocation5 + $0xd0] ss:$48 sps:$4 sm:$0xff]   ;;  %v6962_v38 = vld [vmem:[#allocation5 + $0xd8] ss:$48 sps:$4 sm:$0xff]  }
  0xf5   :  { %3789 = vmatpush1.bf16.msra.mxu0 %v6881_v39  ;;  %3953 = vmatpush1.bf16.msra.mxu1 %v6884_v40  ;;  %v6967_v39 = vld [vmem:[#allocation5 + $0x134] ss:$48 sps:$4 sm:$0xff]   ;;  %v6970_v40 = vld [vmem:[#allocation5 + $0x13c] ss:$48 sps:$4 sm:$0xff]  }
  0xf6   :  { %3790 = vmatprep.subr.bf16.mxu0 %v6889_v41  ;;  %3954 = vmatprep.subr.bf16.mxu1 %v6892_v42  ;;  %v6965_v41 = vld [vmem:[#allocation5 + $0x130] ss:$48 sps:$4 sm:$0xff]   ;;  %v6968_v42 = vld [vmem:[#allocation5 + $0x138] ss:$48 sps:$4 sm:$0xff]  }
  0xf9   :  { %3791 = vmatpush1.bf16.msra.mxu0 %v6887_v43  ;;  %3955 = vmatpush1.bf16.msra.mxu1 %v6890_v44  ;;  %v6973_v43 = vld [vmem:[#allocation5 + $0x194] ss:$48 sps:$4 sm:$0xff]   ;;  %v6976_v44 = vld [vmem:[#allocation5 + $0x19c] ss:$48 sps:$4 sm:$0xff]  }
  0xfa   :  { %3792 = vmatprep.subr.bf16.mxu0 %v6895_v45  ;;  %3956 = vmatprep.subr.bf16.mxu1 %v6898_v46  ;;  %v6971_v45 = vld [vmem:[#allocation5 + $0x190] ss:$48 sps:$4 sm:$0xff]   ;;  %v6974_v46 = vld [vmem:[#allocation5 + $0x198] ss:$48 sps:$4 sm:$0xff]  }
  0xfd   :  { %3793 = vmatpush1.bf16.msra.mxu0 %v6893_v47  ;;  %3957 = vmatpush1.bf16.msra.mxu1 %v6896_v49  ;;  %v6979_v47 = vld [vmem:[#allocation5 + $0x1f4] ss:$48 sps:$4 sm:$0xff]   ;;  %v6982_v49 = vld [vmem:[#allocation5 + $0x1fc] ss:$48 sps:$4 sm:$0xff]  }
  0xfe   :  { %3794 = vmatprep.subr.bf16.mxu0 %v6901_v50  ;;  %3958 = vmatprep.subr.bf16.mxu1 %v6904_v51  ;;  %v6977_v50 = vld [vmem:[#allocation5 + $0x1f0] ss:$48 sps:$4 sm:$0xff]   ;;  %v6980_v51 = vld [vmem:[#allocation5 + $0x1f8] ss:$48 sps:$4 sm:$0xff]  }
 0x101   :  { %3795 = vmatpush1.bf16.msra.mxu0 %v6899_v52  ;;  %3959 = vmatpush1.bf16.msra.mxu1 %v6902_v53  ;;  %v6985_v52 = vld [vmem:[#allocation5 + $0x254] ss:$48 sps:$4 sm:$0xff]   ;;  %v6988_v53 = vld [vmem:[#allocation5 + $0x25c] ss:$48 sps:$4 sm:$0xff]  }
 0x102   :  { %3796 = vmatprep.subr.bf16.mxu0 %v6907_v54  ;;  %3960 = vmatprep.subr.bf16.mxu1 %v6910_v55  ;;  %v6983_v54 = vld [vmem:[#allocation5 + $0x250] ss:$48 sps:$4 sm:$0xff]   ;;  %v6986_v55 = vld [vmem:[#allocation5 + $0x258] ss:$48 sps:$4 sm:$0xff]  }
 0x105   :  { %3797 = vmatpush1.bf16.msra.mxu0 %v6905_v56  ;;  %3961 = vmatpush1.bf16.msra.mxu1 %v6908_v57  ;;  %v6991_v56 = vld [vmem:[#allocation5 + $0x2b4] ss:$48 sps:$4 sm:$0xff]   ;;  %v6994_v57 = vld [vmem:[#allocation5 + $0x2bc] ss:$48 sps:$4 sm:$0xff]  }
 0x106   :  { %3798 = vmatprep.subr.bf16.mxu0 %v6913_v58  ;;  %3962 = vmatprep.subr.bf16.mxu1 %v6916_v59  ;;  %v6989_v58 = vld [vmem:[#allocation5 + $0x2b0] ss:$48 sps:$4 sm:$0xff]   ;;  %v6992_v59 = vld [vmem:[#allocation5 + $0x2b8] ss:$48 sps:$4 sm:$0xff]  }
 0x109   :  { %3799 = vmatpush1.bf16.msra.mxu0 %v6911_v60  ;;  %3963 = vmatpush1.bf16.msra.mxu1 %v6914_v61  ;;  %v6997_v60 = vld [vmem:[#allocation5 + $0x314] ss:$48 sps:$4 sm:$0xff]   ;;  %v7000_v61 = vld [vmem:[#allocation5 + $0x31c] ss:$48 sps:$4 sm:$0xff]  }
 0x10a   :  { %3800 = vmatprep.subr.bf16.mxu0 %v6919_v62  ;;  %3964 = vmatprep.subr.bf16.mxu1 %v6922_v63  ;;  %v6995_v62 = vld [vmem:[#allocation5 + $0x310] ss:$48 sps:$4 sm:$0xff]   ;;  %v6998_v63 = vld [vmem:[#allocation5 + $0x318] ss:$48 sps:$4 sm:$0xff]  }
 0x10d   :  { %3801 = vmatpush1.bf16.msra.mxu0 %v6917_v0  ;;  %3965 = vmatpush1.bf16.msra.mxu1 %v6920_v1  ;;  %v7003_v0 = vld [vmem:[#allocation5 + $0x374] ss:$48 sps:$4 sm:$0xff]   ;;  %v7006_v1 = vld [vmem:[#allocation5 + $0x37c] ss:$48 sps:$4 sm:$0xff]  }
 0x10e   :  { %3802 = vmatprep.subr.bf16.mxu0 %v6925_v2  ;;  %3966 = vmatprep.subr.bf16.mxu1 %v6928_v3  ;;  %v7001_v2 = vld [vmem:[#allocation5 + $0x370] ss:$48 sps:$4 sm:$0xff]   ;;  %v7004_v3 = vld [vmem:[#allocation5 + $0x378] ss:$48 sps:$4 sm:$0xff]  }
 0x111   :  { %3803 = vmatpush1.bf16.msra.mxu0 %v6923_v4  ;;  %3967 = vmatpush1.bf16.msra.mxu1 %v6926_v6  ;;  %v7009_v4 = vld [vmem:[#allocation5 + $0x3d4] ss:$48 sps:$4 sm:$0xff]   ;;  %v7012_v6 = vld [vmem:[#allocation5 + $0x3dc] ss:$48 sps:$4 sm:$0xff]  }
 0x112   :  { %3804 = vmatprep.subr.bf16.mxu0 %v6931_v7  ;;  %3968 = vmatprep.subr.bf16.mxu1 %v6934_v8  ;;  %v7007_v7 = vld [vmem:[#allocation5 + $0x3d0] ss:$48 sps:$4 sm:$0xff]   ;;  %v7010_v8 = vld [vmem:[#allocation5 + $0x3d8] ss:$48 sps:$4 sm:$0xff]  }
 0x115   :  { %3805 = vmatpush1.bf16.msra.mxu0 %v6929_v9  ;;  %3969 = vmatpush1.bf16.msra.mxu1 %v6932_v10  ;;  %v7015_v9 = vld [vmem:[#allocation5 + $0x434] ss:$48 sps:$4 sm:$0xff]   ;;  %v7018_v10 = vld [vmem:[#allocation5 + $0x43c] ss:$48 sps:$4 sm:$0xff]  }
 0x116   :  { %3806 = vmatprep.subr.bf16.mxu0 %v6937_v11  ;;  %3970 = vmatprep.subr.bf16.mxu1 %v6940_v13  ;;  %v7013_v11 = vld [vmem:[#allocation5 + $0x430] ss:$48 sps:$4 sm:$0xff]   ;;  %v7016_v13 = vld [vmem:[#allocation5 + $0x438] ss:$48 sps:$4 sm:$0xff]  }
 0x119   :  { %3807 = vmatpush1.bf16.msra.mxu0 %v6935_v14  ;;  %3971 = vmatpush1.bf16.msra.mxu1 %v6938_v15  ;;  %v7021_v14 = vld [vmem:[#allocation5 + $0x494] ss:$48 sps:$4 sm:$0xff]   ;;  %v7024_v15 = vld [vmem:[#allocation5 + $0x49c] ss:$48 sps:$4 sm:$0xff]  }
 0x11a   :  { %3817 = vmatprep.subr.bf16.mxu0 %v6943_v18  ;;  %3981 = vmatprep.subr.bf16.mxu1 %v6946_v19  ;;  %v7022_v18 = vld [vmem:[#allocation5 + $0x498] ss:$48 sps:$4 sm:$0xff]   ;;  %v7027_v19 = vld [vmem:[#allocation5 + $0x4f4] ss:$48 sps:$4 sm:$0xff]  }
 0x11c   :  { %3809 = vmatmul.mubr.bf16.vlgmr.msra.gmra.mrb[0].mxu0 %v7892_v20  ;;  %3973 = vmatmul.mubr.bf16.vlgmr.msra.gmra.mrb[0].mxu1 %v7892_v20 }
 0x11d   :  { %3818 = vmatpush1.bf16.msra.mxu0 %v6941_v21  ;;  %3982 = vmatpush1.bf16.msra.mxu1 %v6944_v22  ;;  %v7030_v21 = vld [vmem:[#allocation5 + $0x4fc] ss:$48 sps:$4 sm:$0xff]   ;;  %v7025_v22 = vld [vmem:[#allocation5 + $0x4f0] ss:$48 sps:$4 sm:$0xff]  }
 0x11e   :  { %3849 = vmatprep.mubr.bf16.mxu0 %v7780_v25  ;;  %4013 = vmatprep.mubr.bf16.mxu1 %v7780_v25 }
 0x11f   :  { %4022 = vmatprep.subr.bf16.mxu0 %v6949_v23  ;;  %4186 = vmatprep.subr.bf16.mxu1 %v6952_v24  ;;  %v7028_v23 = vld [vmem:[#allocation5 + $0x4f8] ss:$48 sps:$4 sm:$0xff]   ;;  %v7033_v24 = vld [vmem:[#allocation5 + $0x554] ss:$48 sps:$4 sm:$0xff]  }
 0x128   :  { %6323 = vmatmul.mubr.msk.bf16.vlgmr.msra.gmra.mrb[0].mxu0 %vm3690_vm0, %v7898_v28  ;;  %6324 = vmatmul.mubr.msk.bf16.vlgmr.msra.gmra.mrb[0].mxu1 %vm3690_vm0, %v7898_v28 }
 0x129   :  { %4023 = vmatpush1.bf16.msra.mxu0 %v6947_v27  ;;  %4187 = vmatpush1.bf16.msra.mxu1 %v6950_v29  ;;  %v7031_v27 = vld [vmem:[#allocation5 + $0x550] ss:$48 sps:$4 sm:$0xff]   ;;  %v7034_v29 = vld [vmem:[#allocation5 + $0x558] ss:$48 sps:$4 sm:$0xff]  }
 0x12a   :  { %4024 = vmatprep.subr.bf16.mxu0 %v6955_v30  ;;  %4188 = vmatprep.subr.bf16.mxu1 %v6958_v31  ;;  %v7039_v30 = vld [vmem:[#allocation5 + $0x5b4] ss:$48 sps:$4 sm:$0xff]   ;;  %v7042_v31 = vld [vmem:[#allocation5 + $0x5bc] ss:$48 sps:$4 sm:$0xff]  }
 0x12b   :  { %4054 = vmatprep.mubr.bf16.mxu0 %v7872_v48  ;;  %4218 = vmatprep.mubr.bf16.mxu1 %v7872_v48 }
 0x12d   :  { %4025 = vmatpush1.bf16.msra.mxu0 %v6953_v33  ;;  %4189 = vmatpush1.bf16.msra.mxu1 %v6956_v34  ;;  %v7037_v33 = vld [vmem:[#allocation5 + $0x5b0] ss:$48 sps:$4 sm:$0xff]   ;;  %v7040_v34 = vld [vmem:[#allocation5 + $0x5b8] ss:$48 sps:$4 sm:$0xff]  }
 0x12e   :  { %4026 = vmatprep.subr.bf16.mxu0 %v6961_v35  ;;  %4190 = vmatprep.subr.bf16.mxu1 %v6964_v36  ;;  %v7045_v35 = vld [vmem:[#allocation5 + $0x614] ss:$48 sps:$4 sm:$0xff]   ;;  %v7048_v36 = vld [vmem:[#allocation5 + $0x61c] ss:$48 sps:$4 sm:$0xff]  }
 0x131   :  { %4027 = vmatpush1.bf16.msra.mxu0 %v6959_v37  ;;  %4191 = vmatpush1.bf16.msra.mxu1 %v6962_v38  ;;  %v7043_v37 = vld [vmem:[#allocation5 + $0x610] ss:$48 sps:$4 sm:$0xff]   ;;  %v7046_v38 = vld [vmem:[#allocation5 + $0x618] ss:$48 sps:$4 sm:$0xff]  }
 0x132   :  { %4028 = vmatprep.subr.bf16.mxu0 %v6967_v39  ;;  %4192 = vmatprep.subr.bf16.mxu1 %v6970_v40  ;;  %v7051_v39 = vld [vmem:[#allocation5 + $0x674] ss:$48 sps:$4 sm:$0xff]   ;;  %v7054_v40 = vld [vmem:[#allocation5 + $0x67c] ss:$48 sps:$4 sm:$0xff]  }
 0x135   :  { %4029 = vmatpush1.bf16.msra.mxu0 %v6965_v41  ;;  %4193 = vmatpush1.bf16.msra.mxu1 %v6968_v42  ;;  %v7049_v41 = vld [vmem:[#allocation5 + $0x670] ss:$48 sps:$4 sm:$0xff]   ;;  %v7052_v42 = vld [vmem:[#allocation5 + $0x678] ss:$48 sps:$4 sm:$0xff]  }
 0x136   :  { %4030 = vmatprep.subr.bf16.mxu0 %v6973_v43  ;;  %4194 = vmatprep.subr.bf16.mxu1 %v6976_v44  ;;  %v7057_v43 = vld [vmem:[#allocation5 + $0x6d4] ss:$48 sps:$4 sm:$0xff]   ;;  %v7060_v44 = vld [vmem:[#allocation5 + $0x6dc] ss:$48 sps:$4 sm:$0xff]  }
 0x139   :  { %4031 = vmatpush1.bf16.msra.mxu0 %v6971_v45  ;;  %4195 = vmatpush1.bf16.msra.mxu1 %v6974_v46  ;;  %v7055_v45 = vld [vmem:[#allocation5 + $0x6d0] ss:$48 sps:$4 sm:$0xff]   ;;  %v7058_v46 = vld [vmem:[#allocation5 + $0x6d8] ss:$48 sps:$4 sm:$0xff]  }
 0x13a   :  { %4032 = vmatprep.subr.bf16.mxu0 %v6979_v47  ;;  %4196 = vmatprep.subr.bf16.mxu1 %v6982_v49  ;;  %v7063_v47 = vld [vmem:[#allocation5 + $0x734] ss:$48 sps:$4 sm:$0xff]   ;;  %v7066_v49 = vld [vmem:[#allocation5 + $0x73c] ss:$48 sps:$4 sm:$0xff]  }
 0x13d   :  { %4033 = vmatpush1.bf16.msra.mxu0 %v6977_v50  ;;  %4197 = vmatpush1.bf16.msra.mxu1 %v6980_v51  ;;  %v7061_v50 = vld [vmem:[#allocation5 + $0x730] ss:$48 sps:$4 sm:$0xff]   ;;  %v7064_v51 = vld [vmem:[#allocation5 + $0x738] ss:$48 sps:$4 sm:$0xff]  }
 0x13e   :  { %4034 = vmatprep.subr.bf16.mxu0 %v6985_v52  ;;  %4198 = vmatprep.subr.bf16.mxu1 %v6988_v53  ;;  %v7069_v52 = vld [vmem:[#allocation5 + $0x794] ss:$48 sps:$4 sm:$0xff]   ;;  %v7072_v53 = vld [vmem:[#allocation5 + $0x79c] ss:$48 sps:$4 sm:$0xff]  }
 0x141   :  { %4035 = vmatpush1.bf16.msra.mxu0 %v6983_v54  ;;  %4199 = vmatpush1.bf16.msra.mxu1 %v6986_v55  ;;  %v7067_v54 = vld [vmem:[#allocation5 + $0x790] ss:$48 sps:$4 sm:$0xff]   ;;  %v7070_v55 = vld [vmem:[#allocation5 + $0x798] ss:$48 sps:$4 sm:$0xff]  }
 0x142   :  { %4036 = vmatprep.subr.bf16.mxu0 %v6991_v56  ;;  %4200 = vmatprep.subr.bf16.mxu1 %v6994_v57  ;;  %v7075_v56 = vld [vmem:[#allocation5 + $0x7f4] ss:$48 sps:$4 sm:$0xff]   ;;  %v7078_v57 = vld [vmem:[#allocation5 + $0x7fc] ss:$48 sps:$4 sm:$0xff]  }
 0x145   :  { %4037 = vmatpush1.bf16.msra.mxu0 %v6989_v58  ;;  %4201 = vmatpush1.bf16.msra.mxu1 %v6992_v59  ;;  %v7073_v58 = vld [vmem:[#allocation5 + $0x7f0] ss:$48 sps:$4 sm:$0xff]   ;;  %v7076_v59 = vld [vmem:[#allocation5 + $0x7f8] ss:$48 sps:$4 sm:$0xff]  }
 0x146   :  { %4038 = vmatprep.subr.bf16.mxu0 %v6997_v60  ;;  %4202 = vmatprep.subr.bf16.mxu1 %v7000_v61  ;;  %v7081_v60 = vld [vmem:[#allocation5 + $0x854] ss:$48 sps:$4 sm:$0xff]   ;;  %v7084_v61 = vld [vmem:[#allocation5 + $0x85c] ss:$48 sps:$4 sm:$0xff]  }
 0x149   :  { %4039 = vmatpush1.bf16.msra.mxu0 %v6995_v62  ;;  %4203 = vmatpush1.bf16.msra.mxu1 %v6998_v63  ;;  %v7079_v62 = vld [vmem:[#allocation5 + $0x850] ss:$48 sps:$4 sm:$0xff]   ;;  %v7082_v63 = vld [vmem:[#allocation5 + $0x858] ss:$48 sps:$4 sm:$0xff]  }
 0x14a   :  { %4040 = vmatprep.subr.bf16.mxu0 %v7003_v0  ;;  %4204 = vmatprep.subr.bf16.mxu1 %v7006_v1  ;;  %v7087_v0 = vld [vmem:[#allocation5 + $0x8b4] ss:$48 sps:$4 sm:$0xff]   ;;  %v7090_v1 = vld [vmem:[#allocation5 + $0x8bc] ss:$48 sps:$4 sm:$0xff]  }
 0x14d   :  { %4041 = vmatpush1.bf16.msra.mxu0 %v7001_v2  ;;  %4205 = vmatpush1.bf16.msra.mxu1 %v7004_v3  ;;  %v7085_v2 = vld [vmem:[#allocation5 + $0x8b0] ss:$48 sps:$4 sm:$0xff]   ;;  %v7088_v3 = vld [vmem:[#allocation5 + $0x8b8] ss:$48 sps:$4 sm:$0xff]  }
 0x14e   :  { %4042 = vmatprep.subr.bf16.mxu0 %v7009_v4  ;;  %4206 = vmatprep.subr.bf16.mxu1 %v7012_v6  ;;  %v7093_v4 = vld [vmem:[#allocation5 + $0x914] ss:$48 sps:$4 sm:$0xff]   ;;  %v7096_v6 = vld [vmem:[#allocation5 + $0x91c] ss:$48 sps:$4 sm:$0xff]  }
 0x151   :  { %4043 = vmatpush1.bf16.msra.mxu0 %v7007_v7  ;;  %4207 = vmatpush1.bf16.msra.mxu1 %v7010_v8  ;;  %v7091_v7 = vld [vmem:[#allocation5 + $0x910] ss:$48 sps:$4 sm:$0xff]   ;;  %v7094_v8 = vld [vmem:[#allocation5 + $0x918] ss:$48 sps:$4 sm:$0xff]  }
 0x152   :  { %4044 = vmatprep.subr.bf16.mxu0 %v7015_v9  ;;  %4208 = vmatprep.subr.bf16.mxu1 %v7018_v10  ;;  %v7099_v9 = vld [vmem:[#allocation5 + $0x974] ss:$48 sps:$4 sm:$0xff]   ;;  %v7102_v10 = vld [vmem:[#allocation5 + $0x97c] ss:$48 sps:$4 sm:$0xff]  }
 0x155   :  { %4045 = vmatpush1.bf16.msra.mxu0 %v7013_v11  ;;  %4209 = vmatpush1.bf16.msra.mxu1 %v7016_v13  ;;  %v7097_v11 = vld [vmem:[#allocation5 + $0x970] ss:$48 sps:$4 sm:$0xff]   ;;  %v7100_v13 = vld [vmem:[#allocation5 + $0x978] ss:$48 sps:$4 sm:$0xff]  }
 0x156   :  { %4046 = vmatprep.subr.bf16.mxu0 %v7021_v14  ;;  %4210 = vmatprep.subr.bf16.mxu1 %v7024_v15  ;;  %v7105_v14 = vld [vmem:[#allocation5 + $0x9d4] ss:$48 sps:$4 sm:$0xff]   ;;  %v7108_v15 = vld [vmem:[#allocation5 + $0x9dc] ss:$48 sps:$4 sm:$0xff]  }
 0x159   :  { %4047 = vmatpush1.bf16.msra.mxu0 %v7019_v16  ;;  %4211 = vmatpush1.bf16.msra.mxu1 %v7022_v18  ;;  %v7103_v16 = vld [vmem:[#allocation5 + $0x9d0] ss:$48 sps:$4 sm:$0xff]   ;;  %v7106_v18 = vld [vmem:[#allocation5 + $0x9d8] ss:$48 sps:$4 sm:$0xff]  }
 0x15a   :  { %4048 = vmatprep.subr.bf16.mxu0 %v7027_v19  ;;  %4212 = vmatprep.subr.bf16.mxu1 %v7030_v21  ;;  %v7111_v19 = vld [vmem:[#allocation5 + $0xa34] ss:$48 sps:$4 sm:$0xff]   ;;  %v7114_v21 = vld [vmem:[#allocation5 + $0xa3c] ss:$48 sps:$4 sm:$0xff]  }
 0x15d   :  { %4049 = vmatpush1.bf16.msra.mxu0 %v7025_v22  ;;  %4213 = vmatpush1.bf16.msra.mxu1 %v7028_v23  ;;  %v7109_v22 = vld [vmem:[#allocation5 + $0xa30] ss:$48 sps:$4 sm:$0xff]   ;;  %v7112_v23 = vld [vmem:[#allocation5 + $0xa38] ss:$48 sps:$4 sm:$0xff]  }
 0x15e   :  { %4050 = vmatprep.subr.bf16.mxu0 %v7033_v24  ;;  %4214 = vmatprep.subr.bf16.mxu1 %v7036_v26  ;;  %v7117_v24 = vld [vmem:[#allocation5 + $0xa94] ss:$48 sps:$4 sm:$0xff]   ;;  %v7120_v26 = vld [vmem:[#allocation5 + $0xa9c] ss:$48 sps:$4 sm:$0xff]  }
 0x161   :  { %4051 = vmatpush1.bf16.msra.mxu0 %v7031_v27  ;;  %4215 = vmatpush1.bf16.msra.mxu1 %v7034_v29  ;;  %v7115_v27 = vld [vmem:[#allocation5 + $0xa90] ss:$48 sps:$4 sm:$0xff]   ;;  %v7118_v29 = vld [vmem:[#allocation5 + $0xa98] ss:$48 sps:$4 sm:$0xff]  }
 0x162   :  { %4052 = vmatprep.subr.bf16.mxu0 %v7039_v30  ;;  %4216 = vmatprep.subr.bf16.mxu1 %v7042_v31  ;;  %v7123_v30 = vld [vmem:[#allocation5 + $0xaf4] ss:$48 sps:$4 sm:$0xff]   ;;  %v7126_v31 = vld [vmem:[#allocation5 + $0xafc] ss:$48 sps:$4 sm:$0xff]  }
 0x165   :  { %4053 = vmatpush1.bf16.msra.mxu0 %v7037_v33  ;;  %4217 = vmatpush1.bf16.msra.mxu1 %v7040_v34  ;;  %v7121_v33 = vld [vmem:[#allocation5 + $0xaf0] ss:$48 sps:$4 sm:$0xff]   ;;  %v7124_v34 = vld [vmem:[#allocation5 + $0xaf8] ss:$48 sps:$4 sm:$0xff]  }
 0x166   :  { %4063 = vmatprep.subr.bf16.mxu0 %v7045_v35  ;;  %4227 = vmatprep.subr.bf16.mxu1 %v7048_v36  ;;  %v7129_v35 = vld [vmem:[#allocation5 + $0xb54] ss:$48 sps:$4 sm:$0xff]   ;;  %v7132_v36 = vld [vmem:[#allocation5 + $0xb5c] ss:$48 sps:$4 sm:$0xff]  }
 0x168   :  { %4055 = vmatmul.mubr.bf16.vlgmr.msra.gmra.mrb[4].mxu0 %v7876_v5  ;;  %4219 = vmatmul.mubr.bf16.vlgmr.msra.gmra.mrb[4].mxu1 %v7876_v5 }
 0x169   :  { %4064 = vmatpush1.bf16.msra.mxu0 %v7043_v37  ;;  %4228 = vmatpush1.bf16.msra.mxu1 %v7046_v38  ;;  %v7127_v37 = vld [vmem:[#allocation5 + $0xb50] ss:$48 sps:$4 sm:$0xff]   ;;  %v7130_v38 = vld [vmem:[#allocation5 + $0xb58] ss:$48 sps:$4 sm:$0xff]  }
 0x16a   :  { %4065 = vmatprep.subr.bf16.mxu0 %v7051_v39  ;;  %4229 = vmatprep.subr.bf16.mxu1 %v7054_v40  ;;  %v7135_v39 = vld [vmem:[#allocation5 + $0xbb4] ss:$48 sps:$4 sm:$0xff]   ;;  %v7138_v40 = vld [vmem:[#allocation5 + $0xbbc] ss:$48 sps:$4 sm:$0xff]  }
 0x16b   :  { %4095 = vmatprep.mubr.bf16.mxu0 %v7880_v32  ;;  %4259 = vmatprep.mubr.bf16.mxu1 %v7880_v32 }
 0x16d   :  { %4066 = vmatpush1.bf16.msra.mxu0 %v7049_v41  ;;  %4230 = vmatpush1.bf16.msra.mxu1 %v7052_v42  ;;  %v7133_v41 = vld [vmem:[#allocation5 + $0xbb0] ss:$48 sps:$4 sm:$0xff]   ;;  %v7136_v42 = vld [vmem:[#allocation5 + $0xbb8] ss:$48 sps:$4 sm:$0xff]  }
 0x16e   :  { %4067 = vmatprep.subr.bf16.mxu0 %v7057_v43  ;;  %4231 = vmatprep.subr.bf16.mxu1 %v7060_v44  ;;  %v7141_v43 = vld [vmem:[#allocation5 + $0xc14] ss:$48 sps:$4 sm:$0xff]   ;;  %v7144_v44 = vld [vmem:[#allocation5 + $0xc1c] ss:$48 sps:$4 sm:$0xff]  }
 0x171   :  { %4068 = vmatpush1.bf16.msra.mxu0 %v7055_v45  ;;  %4232 = vmatpush1.bf16.msra.mxu1 %v7058_v46  ;;  %v7139_v45 = vld [vmem:[#allocation5 + $0xc10] ss:$48 sps:$4 sm:$0xff]   ;;  %v7142_v46 = vld [vmem:[#allocation5 + $0xc18] ss:$48 sps:$4 sm:$0xff]  }
 0x172   :  { %4069 = vmatprep.subr.bf16.mxu0 %v7063_v47  ;;  %4233 = vmatprep.subr.bf16.mxu1 %v7066_v49  ;;  %v7147_v47 = vld [vmem:[#allocation5 + $0xc74] ss:$48 sps:$4 sm:$0xff]   ;;  %v7150_v49 = vld [vmem:[#allocation5 + $0xc7c] ss:$48 sps:$4 sm:$0xff]  }
 0x175   :  { %4070 = vmatpush1.bf16.msra.mxu0 %v7061_v50  ;;  %4234 = vmatpush1.bf16.msra.mxu1 %v7064_v51  ;;  %v7145_v50 = vld [vmem:[#allocation5 + $0xc70] ss:$48 sps:$4 sm:$0xff]   ;;  %v7148_v51 = vld [vmem:[#allocation5 + $0xc78] ss:$48 sps:$4 sm:$0xff]  }
 0x176   :  { %4071 = vmatprep.subr.bf16.mxu0 %v7069_v52  ;;  %4235 = vmatprep.subr.bf16.mxu1 %v7072_v53  ;;  %v7153_v52 = vld [vmem:[#allocation5 + $0xcd4] ss:$48 sps:$4 sm:$0xff]   ;;  %v7156_v53 = vld [vmem:[#allocation5 + $0xcdc] ss:$48 sps:$4 sm:$0xff]  }
 0x179   :  { %4072 = vmatpush1.bf16.msra.mxu0 %v7067_v54  ;;  %4236 = vmatpush1.bf16.msra.mxu1 %v7070_v55  ;;  %v7151_v54 = vld [vmem:[#allocation5 + $0xcd0] ss:$48 sps:$4 sm:$0xff]   ;;  %v7154_v55 = vld [vmem:[#allocation5 + $0xcd8] ss:$48 sps:$4 sm:$0xff]  }
 0x17a   :  { %4073 = vmatprep.subr.bf16.mxu0 %v7075_v56  ;;  %4237 = vmatprep.subr.bf16.mxu1 %v7078_v57  ;;  %v7159_v56 = vld [vmem:[#allocation5 + $0xd34] ss:$48 sps:$4 sm:$0xff]   ;;  %v7162_v57 = vld [vmem:[#allocation5 + $0xd3c] ss:$48 sps:$4 sm:$0xff]  }
 0x17d   :  { %4074 = vmatpush1.bf16.msra.mxu0 %v7073_v58  ;;  %4238 = vmatpush1.bf16.msra.mxu1 %v7076_v59  ;;  %v7157_v58 = vld [vmem:[#allocation5 + $0xd30] ss:$48 sps:$4 sm:$0xff]   ;;  %v7160_v59 = vld [vmem:[#allocation5 + $0xd38] ss:$48 sps:$4 sm:$0xff]  }
 0x17e   :  { %4075 = vmatprep.subr.bf16.mxu0 %v7081_v60  ;;  %4239 = vmatprep.subr.bf16.mxu1 %v7084_v61  ;;  %v7165_v60 = vld [vmem:[#allocation5 + $0xd94] ss:$48 sps:$4 sm:$0xff]   ;;  %v7168_v61 = vld [vmem:[#allocation5 + $0xd9c] ss:$48 sps:$4 sm:$0xff]  }
 0x181   :  { %4076 = vmatpush1.bf16.msra.mxu0 %v7079_v62  ;;  %4240 = vmatpush1.bf16.msra.mxu1 %v7082_v63  ;;  %v7163_v62 = vld [vmem:[#allocation5 + $0xd90] ss:$48 sps:$4 sm:$0xff]   ;;  %v7166_v63 = vld [vmem:[#allocation5 + $0xd98] ss:$48 sps:$4 sm:$0xff]  }
 0x182   :  { %4077 = vmatprep.subr.bf16.mxu0 %v7087_v0  ;;  %4241 = vmatprep.subr.bf16.mxu1 %v7090_v1  ;;  %v7171_v0 = vld [vmem:[#allocation5 + $0xdf4] ss:$48 sps:$4 sm:$0xff]   ;;  %v7174_v1 = vld [vmem:[#allocation5 + $0xdfc] ss:$48 sps:$4 sm:$0xff]  }
 0x185   :  { %4078 = vmatpush1.bf16.msra.mxu0 %v7085_v2  ;;  %4242 = vmatpush1.bf16.msra.mxu1 %v7088_v3  ;;  %v7169_v2 = vld [vmem:[#allocation5 + $0xdf0] ss:$48 sps:$4 sm:$0xff]   ;;  %v7172_v3 = vld [vmem:[#allocation5 + $0xdf8] ss:$48 sps:$4 sm:$0xff]  }
 0x186   :  { %4079 = vmatprep.subr.bf16.mxu0 %v7093_v4  ;;  %4243 = vmatprep.subr.bf16.mxu1 %v7096_v6  ;;  %v7177_v4 = vld [vmem:[#allocation5 + $0xe54] ss:$48 sps:$4 sm:$0xff]   ;;  %v7180_v6 = vld [vmem:[#allocation5 + $0xe5c] ss:$48 sps:$4 sm:$0xff]  }
 0x189   :  { %4080 = vmatpush1.bf16.msra.mxu0 %v7091_v7  ;;  %4244 = vmatpush1.bf16.msra.mxu1 %v7094_v8  ;;  %v7175_v7 = vld [vmem:[#allocation5 + $0xe50] ss:$48 sps:$4 sm:$0xff]   ;;  %v7178_v8 = vld [vmem:[#allocation5 + $0xe58] ss:$48 sps:$4 sm:$0xff]  }
 0x18a   :  { %4081 = vmatprep.subr.bf16.mxu0 %v7099_v9  ;;  %4245 = vmatprep.subr.bf16.mxu1 %v7102_v10  ;;  %v7183_v9 = vld [vmem:[#allocation5 + $0xeb4] ss:$48 sps:$4 sm:$0xff]   ;;  %v7186_v10 = vld [vmem:[#allocation5 + $0xebc] ss:$48 sps:$4 sm:$0xff]  }
 0x18d   :  { %4082 = vmatpush1.bf16.msra.mxu0 %v7097_v11  ;;  %4246 = vmatpush1.bf16.msra.mxu1 %v7100_v13  ;;  %v7181_v11 = vld [vmem:[#allocation5 + $0xeb0] ss:$48 sps:$4 sm:$0xff]   ;;  %v7184_v13 = vld [vmem:[#allocation5 + $0xeb8] ss:$48 sps:$4 sm:$0xff]  }
 0x18e   :  { %4083 = vmatprep.subr.bf16.mxu0 %v7105_v14  ;;  %4247 = vmatprep.subr.bf16.mxu1 %v7108_v15  ;;  %v7189_v14 = vld [vmem:[#allocation5 + $0xf14] ss:$48 sps:$4 sm:$0xff]   ;;  %v7192_v15 = vld [vmem:[#allocation5 + $0xf1c] ss:$48 sps:$4 sm:$0xff]  }
 0x191   :  { %4084 = vmatpush1.bf16.msra.mxu0 %v7103_v16  ;;  %4248 = vmatpush1.bf16.msra.mxu1 %v7106_v18  ;;  %v7187_v16 = vld [vmem:[#allocation5 + $0xf10] ss:$48 sps:$4 sm:$0xff]   ;;  %v7190_v18 = vld [vmem:[#allocation5 + $0xf18] ss:$48 sps:$4 sm:$0xff]  }
 0x192   :  { %4085 = vmatprep.subr.bf16.mxu0 %v7111_v19  ;;  %4249 = vmatprep.subr.bf16.mxu1 %v7114_v21  ;;  %v7195_v19 = vld [vmem:[#allocation5 + $0xf74] ss:$48 sps:$4 sm:$0xff]   ;;  %v7198_v21 = vld [vmem:[#allocation5 + $0xf7c] ss:$48 sps:$4 sm:$0xff]  }
 0x195   :  { %4086 = vmatpush1.bf16.msra.mxu0 %v7109_v22  ;;  %4250 = vmatpush1.bf16.msra.mxu1 %v7112_v23  ;;  %v7193_v22 = vld [vmem:[#allocation5 + $0xf70] ss:$48 sps:$4 sm:$0xff]   ;;  %v7196_v23 = vld [vmem:[#allocation5 + $0xf78] ss:$48 sps:$4 sm:$0xff]  }
 0x196   :  { %4087 = vmatprep.subr.bf16.mxu0 %v7117_v24  ;;  %4251 = vmatprep.subr.bf16.mxu1 %v7120_v26  ;;  %v7201_v24 = vld [vmem:[#allocation5 + $0xfd4] ss:$48 sps:$4 sm:$0xff]   ;;  %v7204_v26 = vld [vmem:[#allocation5 + $0xfdc] ss:$48 sps:$4 sm:$0xff]  }
 0x199   :  { %4088 = vmatpush1.bf16.msra.mxu0 %v7115_v27  ;;  %4252 = vmatpush1.bf16.msra.mxu1 %v7118_v29  ;;  %v7199_v27 = vld [vmem:[#allocation5 + $0xfd0] ss:$48 sps:$4 sm:$0xff]   ;;  %v7202_v29 = vld [vmem:[#allocation5 + $0xfd8] ss:$48 sps:$4 sm:$0xff]  }
 0x19a   :  { %4089 = vmatprep.subr.bf16.mxu0 %v7123_v30  ;;  %4253 = vmatprep.subr.bf16.mxu1 %v7126_v31  ;;  %v7207_v30 = vld [vmem:[#allocation5 + $0x1034] ss:$48 sps:$4 sm:$0xff]   ;;  %v7210_v31 = vld [vmem:[#allocation5 + $0x103c] ss:$48 sps:$4 sm:$0xff]  }
 0x19d   :  { %4090 = vmatpush1.bf16.msra.mxu0 %v7121_v33  ;;  %4254 = vmatpush1.bf16.msra.mxu1 %v7124_v34  ;;  %v7205_v33 = vld [vmem:[#allocation5 + $0x1030] ss:$48 sps:$4 sm:$0xff]   ;;  %v7208_v34 = vld [vmem:[#allocation5 + $0x1038] ss:$48 sps:$4 sm:$0xff]  }
 0x19e   :  { %4091 = vmatprep.subr.bf16.mxu0 %v7129_v35  ;;  %4255 = vmatprep.subr.bf16.mxu1 %v7132_v36  ;;  %v7213_v35 = vld [vmem:[#allocation5 + $0x1094] ss:$48 sps:$4 sm:$0xff]   ;;  %v7216_v36 = vld [vmem:[#allocation5 + $0x109c] ss:$48 sps:$4 sm:$0xff]  }
 0x1a1   :  { %4092 = vmatpush1.bf16.msra.mxu0 %v7127_v37  ;;  %4256 = vmatpush1.bf16.msra.mxu1 %v7130_v38  ;;  %v7211_v37 = vld [vmem:[#allocation5 + $0x1090] ss:$48 sps:$4 sm:$0xff]   ;;  %v7214_v38 = vld [vmem:[#allocation5 + $0x1098] ss:$48 sps:$4 sm:$0xff]  }
 0x1a2   :  { %4093 = vmatprep.subr.bf16.mxu0 %v7135_v39  ;;  %4257 = vmatprep.subr.bf16.mxu1 %v7138_v40  ;;  %v7219_v39 = vld [vmem:[#allocation5 + $0x10f4] ss:$48 sps:$4 sm:$0xff]   ;;  %v7222_v40 = vld [vmem:[#allocation5 + $0x10fc] ss:$48 sps:$4 sm:$0xff]  }
 0x1a5   :  { %4094 = vmatpush1.bf16.msra.mxu0 %v7133_v41  ;;  %4258 = vmatpush1.bf16.msra.mxu1 %v7136_v42  ;;  %v7217_v41 = vld [vmem:[#allocation5 + $0x10f0] ss:$48 sps:$4 sm:$0xff]   ;;  %v7220_v42 = vld [vmem:[#allocation5 + $0x10f8] ss:$48 sps:$4 sm:$0xff]  }
 0x1a6   :  { %4104 = vmatprep.subr.bf16.mxu0 %v7141_v43  ;;  %4268 = vmatprep.subr.bf16.mxu1 %v7144_v44  ;;  %v7225_v43 = vld [vmem:[#allocation5 + $0x1154] ss:$48 sps:$4 sm:$0xff]   ;;  %v7228_v44 = vld [vmem:[#allocation5 + $0x115c] ss:$48 sps:$4 sm:$0xff]  }
 0x1a8   :  { %4096 = vmatmul.mubr.bf16.vlgmr.msra.gmra.mrb[4].mxu0 %v7884_v12  ;;  %4260 = vmatmul.mubr.bf16.vlgmr.msra.gmra.mrb[4].mxu1 %v7884_v12 }
 0x1a9   :  { %4105 = vmatpush1.bf16.msra.mxu0 %v7139_v45  ;;  %4269 = vmatpush1.bf16.msra.mxu1 %v7142_v46  ;;  %v7223_v45 = vld [vmem:[#allocation5 + $0x1150] ss:$48 sps:$4 sm:$0xff]   ;;  %v7226_v46 = vld [vmem:[#allocation5 + $0x1158] ss:$48 sps:$4 sm:$0xff]  }
 0x1aa   :  { %4106 = vmatprep.subr.bf16.mxu0 %v7147_v47  ;;  %4270 = vmatprep.subr.bf16.mxu1 %v7150_v49  ;;  %v7231_v47 = vld [vmem:[#allocation5 + $0x11b4] ss:$48 sps:$4 sm:$0xff]   ;;  %v7234_v49 = vld [vmem:[#allocation5 + $0x11bc] ss:$48 sps:$4 sm:$0xff]  }
 0x1ab   :  { %4136 = vmatprep.mubr.bf16.mxu0 %v7886_v17  ;;  %4300 = vmatprep.mubr.bf16.mxu1 %v7886_v17 }
 0x1ad   :  { %4107 = vmatpush1.bf16.msra.mxu0 %v7145_v50  ;;  %4271 = vmatpush1.bf16.msra.mxu1 %v7148_v51  ;;  %v7229_v50 = vld [vmem:[#allocation5 + $0x11b0] ss:$48 sps:$4 sm:$0xff]   ;;  %v7232_v51 = vld [vmem:[#allocation5 + $0x11b8] ss:$48 sps:$4 sm:$0xff]  }
 0x1ae   :  { %4108 = vmatprep.subr.bf16.mxu0 %v7153_v52  ;;  %4272 = vmatprep.subr.bf16.mxu1 %v7156_v53  ;;  %v7237_v52 = vld [vmem:[#allocation5 + $0x1214] ss:$48 sps:$4 sm:$0xff]   ;;  %v7240_v53 = vld [vmem:[#allocation5 + $0x121c] ss:$48 sps:$4 sm:$0xff]  }
 0x1b1   :  { %4109 = vmatpush1.bf16.msra.mxu0 %v7151_v54  ;;  %4273 = vmatpush1.bf16.msra.mxu1 %v7154_v55  ;;  %v7235_v54 = vld [vmem:[#allocation5 + $0x1210] ss:$48 sps:$4 sm:$0xff]   ;;  %v7238_v55 = vld [vmem:[#allocation5 + $0x1218] ss:$48 sps:$4 sm:$0xff]  }
 0x1b2   :  { %4110 = vmatprep.subr.bf16.mxu0 %v7159_v56  ;;  %4274 = vmatprep.subr.bf16.mxu1 %v7162_v57  ;;  %v7243_v56 = vld [vmem:[#allocation5 + $0x24] ss:$48 sps:$4 sm:$0xff]   ;;  %v7246_v57 = vld [vmem:[#allocation5 + $0x2c] ss:$48 sps:$4 sm:$0xff]  }
 0x1b5   :  { %4111 = vmatpush1.bf16.msra.mxu0 %v7157_v58  ;;  %4275 = vmatpush1.bf16.msra.mxu1 %v7160_v59  ;;  %v7241_v58 = vld [vmem:[#allocation5 + $0x20] ss:$48 sps:$4 sm:$0xff]   ;;  %v7244_v59 = vld [vmem:[#allocation5 + $0x28] ss:$48 sps:$4 sm:$0xff]  }
 0x1b6   :  { %4112 = vmatprep.subr.bf16.mxu0 %v7165_v60  ;;  %4276 = vmatprep.subr.bf16.mxu1 %v7168_v61  ;;  %v7249_v60 = vld [vmem:[#allocation5 + $0x84] ss:$48 sps:$4 sm:$0xff]   ;;  %v7252_v61 = vld [vmem:[#allocation5 + $0x8c] ss:$48 sps:$4 sm:$0xff]  }
 0x1b9   :  { %4113 = vmatpush1.bf16.msra.mxu0 %v7163_v62  ;;  %4277 = vmatpush1.bf16.msra.mxu1 %v7166_v63  ;;  %v7247_v62 = vld [vmem:[#allocation5 + $0x80] ss:$48 sps:$4 sm:$0xff]   ;;  %v7250_v63 = vld [vmem:[#allocation5 + $0x88] ss:$48 sps:$4 sm:$0xff]  }
 0x1ba   :  { %4114 = vmatprep.subr.bf16.mxu0 %v7171_v0  ;;  %4278 = vmatprep.subr.bf16.mxu1 %v7174_v1  ;;  %v7255_v0 = vld [vmem:[#allocation5 + $0xe4] ss:$48 sps:$4 sm:$0xff]   ;;  %v7258_v1 = vld [vmem:[#allocation5 + $0xec] ss:$48 sps:$4 sm:$0xff]  }
 0x1bd   :  { %4115 = vmatpush1.bf16.msra.mxu0 %v7169_v2  ;;  %4279 = vmatpush1.bf16.msra.mxu1 %v7172_v3  ;;  %v7253_v2 = vld [vmem:[#allocation5 + $0xe0] ss:$48 sps:$4 sm:$0xff]   ;;  %v7256_v3 = vld [vmem:[#allocation5 + $0xe8] ss:$48 sps:$4 sm:$0xff]  }
 0x1be   :  { %4116 = vmatprep.subr.bf16.mxu0 %v7177_v4  ;;  %4280 = vmatprep.subr.bf16.mxu1 %v7180_v6  ;;  %v7261_v4 = vld [vmem:[#allocation5 + $0x144] ss:$48 sps:$4 sm:$0xff]   ;;  %v7264_v6 = vld [vmem:[#allocation5 + $0x14c] ss:$48 sps:$4 sm:$0xff]  }
 0x1c1   :  { %4117 = vmatpush1.bf16.msra.mxu0 %v7175_v7  ;;  %4281 = vmatpush1.bf16.msra.mxu1 %v7178_v8 }
 0x1c2   :  { %4118 = vmatprep.subr.bf16.mxu0 %v7183_v9  ;;  %4282 = vmatprep.subr.bf16.mxu1 %v7186_v10 }
 0x1c5   :  { %4119 = vmatpush1.bf16.msra.mxu0 %v7181_v11  ;;  %4283 = vmatpush1.bf16.msra.mxu1 %v7184_v13  ;;  %v7259_v13 = vld [vmem:[#allocation5 + $0x140] ss:$48 sps:$4 sm:$0xff]  }
 0x1c6   :  { %4120 = vmatprep.subr.bf16.mxu0 %v7189_v14  ;;  %4284 = vmatprep.subr.bf16.mxu1 %v7192_v15  ;;  %v7262_v14 = vld [vmem:[#allocation5 + $0x148] ss:$48 sps:$4 sm:$0xff]  }
 0x1c9   :  { %4121 = vmatpush1.bf16.msra.mxu0 %v7187_v16  ;;  %4285 = vmatpush1.bf16.msra.mxu1 %v7190_v18  ;;  %v7267_v18 = vld [vmem:[#allocation5 + $0x1a4] ss:$48 sps:$4 sm:$0xff]  }
 0x1ca   :  { %4122 = vmatprep.subr.bf16.mxu0 %v7195_v19  ;;  %4286 = vmatprep.subr.bf16.mxu1 %v7198_v21  ;;  %v7270_v19 = vld [vmem:[#allocation5 + $0x1ac] ss:$48 sps:$4 sm:$0xff]   ;;  %v7265_v21 = vld [vmem:[#allocation5 + $0x1a0] ss:$48 sps:$4 sm:$0xff]  }
 0x1cd   :  { %4123 = vmatpush1.bf16.msra.mxu0 %v7193_v22  ;;  %4287 = vmatpush1.bf16.msra.mxu1 %v7196_v23  ;;  %v7268_v22 = vld [vmem:[#allocation5 + $0x1a8] ss:$48 sps:$4 sm:$0xff]   ;;  %v7273_v23 = vld [vmem:[#allocation5 + $0x204] ss:$48 sps:$4 sm:$0xff]  }
 0x1ce   :  { %4124 = vmatprep.subr.bf16.mxu0 %v7201_v24  ;;  %4288 = vmatprep.subr.bf16.mxu1 %v7204_v26  ;;  %v7276_v24 = vld [vmem:[#allocation5 + $0x20c] ss:$48 sps:$4 sm:$0xff]   ;;  %v7271_v26 = vld [vmem:[#allocation5 + $0x200] ss:$48 sps:$4 sm:$0xff]  }
 0x1d1   :  { %4125 = vmatpush1.bf16.msra.mxu0 %v7199_v27  ;;  %4289 = vmatpush1.bf16.msra.mxu1 %v7202_v29  ;;  %v7274_v27 = vld [vmem:[#allocation5 + $0x208] ss:$48 sps:$4 sm:$0xff]   ;;  %v7279_v29 = vld [vmem:[#allocation5 + $0x264] ss:$48 sps:$4 sm:$0xff]  }
 0x1d2   :  { %4126 = vmatprep.subr.bf16.mxu0 %v7207_v30  ;;  %4290 = vmatprep.subr.bf16.mxu1 %v7210_v31  ;;  %v7282_v30 = vld [vmem:[#allocation5 + $0x26c] ss:$48 sps:$4 sm:$0xff]   ;;  %v7277_v31 = vld [vmem:[#allocation5 + $0x260] ss:$48 sps:$4 sm:$0xff]  }
 0x1d5   :  { %4127 = vmatpush1.bf16.msra.mxu0 %v7205_v33  ;;  %4291 = vmatpush1.bf16.msra.mxu1 %v7208_v34  ;;  %v7280_v33 = vld [vmem:[#allocation5 + $0x268] ss:$48 sps:$4 sm:$0xff]   ;;  %v7285_v34 = vld [vmem:[#allocation5 + $0x2c4] ss:$48 sps:$4 sm:$0xff]  }
 0x1d6   :  { %4128 = vmatprep.subr.bf16.mxu0 %v7213_v35  ;;  %4292 = vmatprep.subr.bf16.mxu1 %v7216_v36  ;;  %v7288_v35 = vld [vmem:[#allocation5 + $0x2cc] ss:$48 sps:$4 sm:$0xff]   ;;  %v7283_v36 = vld [vmem:[#allocation5 + $0x2c0] ss:$48 sps:$4 sm:$0xff]  }
 0x1d9   :  { %4129 = vmatpush1.bf16.msra.mxu0 %v7211_v37  ;;  %4293 = vmatpush1.bf16.msra.mxu1 %v7214_v38  ;;  %v7286_v37 = vld [vmem:[#allocation5 + $0x2c8] ss:$48 sps:$4 sm:$0xff]   ;;  %v7291_v38 = vld [vmem:[#allocation5 + $0x324] ss:$48 sps:$4 sm:$0xff]  }
 0x1da   :  { %4130 = vmatprep.subr.bf16.mxu0 %v7219_v39  ;;  %4294 = vmatprep.subr.bf16.mxu1 %v7222_v40  ;;  %v7294_v39 = vld [vmem:[#allocation5 + $0x32c] ss:$48 sps:$4 sm:$0xff]   ;;  %v7289_v40 = vld [vmem:[#allocation5 + $0x320] ss:$48 sps:$4 sm:$0xff]  }
 0x1dd   :  { %4131 = vmatpush1.bf16.msra.mxu0 %v7217_v41  ;;  %4295 = vmatpush1.bf16.msra.mxu1 %v7220_v42  ;;  %v7292_v41 = vld [vmem:[#allocation5 + $0x328] ss:$48 sps:$4 sm:$0xff]   ;;  %v7297_v42 = vld [vmem:[#allocation5 + $0x384] ss:$48 sps:$4 sm:$0xff]  }
 0x1de   :  { %4132 = vmatprep.subr.bf16.mxu0 %v7225_v43  ;;  %4296 = vmatprep.subr.bf16.mxu1 %v7228_v44  ;;  %v7300_v43 = vld [vmem:[#allocation5 + $0x38c] ss:$48 sps:$4 sm:$0xff]   ;;  %v7295_v44 = vld [vmem:[#allocation5 + $0x380] ss:$48 sps:$4 sm:$0xff]  }
 0x1e1   :  { %4133 = vmatpush1.bf16.msra.mxu0 %v7223_v45  ;;  %4297 = vmatpush1.bf16.msra.mxu1 %v7226_v46  ;;  %v7298_v45 = vld [vmem:[#allocation5 + $0x388] ss:$48 sps:$4 sm:$0xff]   ;;  %v7303_v46 = vld [vmem:[#allocation5 + $0x3e4] ss:$48 sps:$4 sm:$0xff]  }
 0x1e2   :  { %4134 = vmatprep.subr.bf16.mxu0 %v7231_v47  ;;  %4298 = vmatprep.subr.bf16.mxu1 %v7234_v49  ;;  %v7306_v47 = vld [vmem:[#allocation5 + $0x3ec] ss:$48 sps:$4 sm:$0xff]   ;;  %v7301_v49 = vld [vmem:[#allocation5 + $0x3e0] ss:$48 sps:$4 sm:$0xff]  }
 0x1e5   :  { %4135 = vmatpush1.bf16.msra.mxu0 %v7229_v50  ;;  %4299 = vmatpush1.bf16.msra.mxu1 %v7232_v51  ;;  %v7304_v50 = vld [vmem:[#allocation5 + $0x3e8] ss:$48 sps:$4 sm:$0xff]   ;;  %v7309_v51 = vld [vmem:[#allocation5 + $0x444] ss:$48 sps:$4 sm:$0xff]  }
 0x1e6   :  { %4145 = vmatprep.subr.bf16.mxu0 %v7237_v52  ;;  %4309 = vmatprep.subr.bf16.mxu1 %v7240_v53  ;;  %v7312_v52 = vld [vmem:[#allocation5 + $0x44c] ss:$48 sps:$4 sm:$0xff]   ;;  %v7307_v53 = vld [vmem:[#allocation5 + $0x440] ss:$48 sps:$4 sm:$0xff]  }
 0x1e8   :  { %4137 = vmatmul.mubr.bf16.vlgmr.msra.gmra.mrb[4].mxu0 %v7892_v20  ;;  %4301 = vmatmul.mubr.bf16.vlgmr.msra.gmra.mrb[4].mxu1 %v7892_v20 }
 0x1e9   :  { %4146 = vmatpush1.bf16.msra.mxu0 %v7235_v54  ;;  %4310 = vmatpush1.bf16.msra.mxu1 %v7238_v55  ;;  %v7310_v54 = vld [vmem:[#allocation5 + $0x448] ss:$48 sps:$4 sm:$0xff]   ;;  %v7315_v55 = vld [vmem:[#allocation5 + $0x4a4] ss:$48 sps:$4 sm:$0xff]  }
 0x1ea   :  { %4177 = vmatprep.mubr.bf16.mxu0 %v7780_v25  ;;  %4341 = vmatprep.mubr.bf16.mxu1 %v7780_v25 }
 0x1eb   :  { %4350 = vmatprep.subr.bf16.mxu0 %v7243_v56  ;;  %4514 = vmatprep.subr.bf16.mxu1 %v7246_v57  ;;  %v7318_v56 = vld [vmem:[#allocation5 + $0x4ac] ss:$48 sps:$4 sm:$0xff]   ;;  %v7313_v57 = vld [vmem:[#allocation5 + $0x4a0] ss:$48 sps:$4 sm:$0xff]  }
 0x1f4   :  { %6325 = vmatmul.mubr.msk.bf16.vlgmr.msra.gmra.mrb[4].mxu0 %vm3690_vm0, %v7898_v28  ;;  %6326 = vmatmul.mubr.msk.bf16.vlgmr.msra.gmra.mrb[4].mxu1 %vm3690_vm0, %v7898_v28 }
 0x1f5   :  { %4351 = vmatpush1.bf16.msra.mxu0 %v7241_v58  ;;  %4515 = vmatpush1.bf16.msra.mxu1 %v7244_v59  ;;  %v7316_v58 = vld [vmem:[#allocation5 + $0x4a8] ss:$48 sps:$4 sm:$0xff]   ;;  %v7321_v59 = vld [vmem:[#allocation5 + $0x504] ss:$48 sps:$4 sm:$0xff]  }
 0x1f6   :  { %4352 = vmatprep.subr.bf16.mxu0 %v7249_v60  ;;  %4516 = vmatprep.subr.bf16.mxu1 %v7252_v61  ;;  %v7324_v60 = vld [vmem:[#allocation5 + $0x50c] ss:$48 sps:$4 sm:$0xff]   ;;  %v7319_v61 = vld [vmem:[#allocation5 + $0x500] ss:$48 sps:$4 sm:$0xff]  }
 0x1f7   :  { %4382 = vmatprep.mubr.bf16.mxu0 %v7872_v48  ;;  %4546 = vmatprep.mubr.bf16.mxu1 %v7872_v48 }
 0x1f9   :  { %4353 = vmatpush1.bf16.msra.mxu0 %v7247_v62  ;;  %4517 = vmatpush1.bf16.msra.mxu1 %v7250_v63  ;;  %v7322_v62 = vld [vmem:[#allocation5 + $0x508] ss:$48 sps:$4 sm:$0xff]   ;;  %v7327_v63 = vld [vmem:[#allocation5 + $0x564] ss:$48 sps:$4 sm:$0xff]  }
 0x1fa   :  { %4354 = vmatprep.subr.bf16.mxu0 %v7255_v0  ;;  %4518 = vmatprep.subr.bf16.mxu1 %v7258_v1  ;;  %v7330_v0 = vld [vmem:[#allocation5 + $0x56c] ss:$48 sps:$4 sm:$0xff]   ;;  %v7325_v1 = vld [vmem:[#allocation5 + $0x560] ss:$48 sps:$4 sm:$0xff]  }
 0x1fb   :  { %v7924_v7 = vpop.f32.mrb[0].mxu0  ;;  %v7926_v8 = vpop.f32.mrb[0].mxu1 }
 0x1fc   :  { %v7928_v9 = vpop.f32.mrb[1].mxu0  ;;  %v7930_v10 = vpop.f32.mrb[1].mxu1 }
 0x1fd   :  { %4355 = vmatpush1.bf16.msra.mxu0 %v7253_v2  ;;  %4519 = vmatpush1.bf16.msra.mxu1 %v7256_v3  ;;  %v3855_v11 = vpop.f32.mrb[2].mxu0  ;;  %v4019_v48 = vpop.f32.mrb[2].mxu1  ;;  %v7328_v2 = vld [vmem:[#allocation5 + $0x568] ss:$48 sps:$4 sm:$0xff]   ;;  %v7333_v3 = vld [vmem:[#allocation5 + $0x5c4] ss:$48 sps:$4 sm:$0xff]  }
 0x1fe   :  { %v3856_v15 = vpop.f32.mrb[3].mxu0  ;;  %v4020_v16 = vpop.f32.mrb[3].mxu1  ;;  %4356 = vmatprep.subr.bf16.mxu0 %v7261_v4  ;;  %4520 = vmatprep.subr.bf16.mxu1 %v7264_v6  ;;  %v7336_v4 = vld [vmem:[#allocation5 + $0x5cc] ss:$48 sps:$4 sm:$0xff]   ;;  %v7331_v6 = vld [vmem:[#allocation5 + $0x5c0] ss:$48 sps:$4 sm:$0xff]  }
 0x1ff   :  { %v7334_v11 = vld [vmem:[#allocation5 + $0x5c8] ss:$48 sps:$4 sm:$0xff]   ;;  %v7339_v48 = vld [vmem:[#allocation5 + $0x624] ss:$48 sps:$4 sm:$0xff]  }
 0x200   :  { %v7340_v15 = vld [vmem:[#allocation5 + $0x628] ss:$48 sps:$4 sm:$0xff]   ;;  %v7345_v16 = vld [vmem:[#allocation5 + $0x684] ss:$48 sps:$4 sm:$0xff]  }
 0x201   :  { %4357 = vmatpush1.bf16.msra.mxu0 %v7259_v13  ;;  %4521 = vmatpush1.bf16.msra.mxu1 %v7262_v14  ;;  %v7342_v13 = vld [vmem:[#allocation5 + $0x62c] ss:$48 sps:$4 sm:$0xff]   ;;  %v7337_v14 = vld [vmem:[#allocation5 + $0x620] ss:$48 sps:$4 sm:$0xff]  }
 0x202   :  { %4358 = vmatprep.subr.bf16.mxu0 %v7267_v18  ;;  %4522 = vmatprep.subr.bf16.mxu1 %v7270_v19  ;;  %v7348_v18 = vld [vmem:[#allocation5 + $0x68c] ss:$48 sps:$4 sm:$0xff]   ;;  %v7343_v19 = vld [vmem:[#allocation5 + $0x680] ss:$48 sps:$4 sm:$0xff]  }
 0x205   :  { %4359 = vmatpush1.bf16.msra.mxu0 %v7265_v21  ;;  %4523 = vmatpush1.bf16.msra.mxu1 %v7268_v22  ;;  %v7346_v21 = vld [vmem:[#allocation5 + $0x688] ss:$48 sps:$4 sm:$0xff]   ;;  %v7351_v22 = vld [vmem:[#allocation5 + $0x6e4] ss:$48 sps:$4 sm:$0xff]  }
 0x206   :  { %4360 = vmatprep.subr.bf16.mxu0 %v7273_v23  ;;  %4524 = vmatprep.subr.bf16.mxu1 %v7276_v24  ;;  %v7354_v23 = vld [vmem:[#allocation5 + $0x6ec] ss:$48 sps:$4 sm:$0xff]   ;;  %v7349_v24 = vld [vmem:[#allocation5 + $0x6e0] ss:$48 sps:$4 sm:$0xff]  }
 0x209   :  { %4361 = vmatpush1.bf16.msra.mxu0 %v7271_v26  ;;  %4525 = vmatpush1.bf16.msra.mxu1 %v7274_v27  ;;  %v7352_v26 = vld [vmem:[#allocation5 + $0x6e8] ss:$48 sps:$4 sm:$0xff]   ;;  %v7357_v27 = vld [vmem:[#allocation5 + $0x744] ss:$48 sps:$4 sm:$0xff]  }
 0x20a   :  { %4362 = vmatprep.subr.bf16.mxu0 %v7279_v29  ;;  %4526 = vmatprep.subr.bf16.mxu1 %v7282_v30  ;;  %v7355_v29 = vld [vmem:[#allocation5 + $0x740] ss:$48 sps:$4 sm:$0xff]   ;;  %v7358_v30 = vld [vmem:[#allocation5 + $0x748] ss:$48 sps:$4 sm:$0xff]  }
 0x20d   :  { %4363 = vmatpush1.bf16.msra.mxu0 %v7277_v31  ;;  %4527 = vmatpush1.bf16.msra.mxu1 %v7280_v33  ;;  %v7363_v31 = vld [vmem:[#allocation5 + $0x7a4] ss:$48 sps:$4 sm:$0xff]   ;;  %v7366_v33 = vld [vmem:[#allocation5 + $0x7ac] ss:$48 sps:$4 sm:$0xff]  }
 0x20e   :  { %4364 = vmatprep.subr.bf16.mxu0 %v7285_v34  ;;  %4528 = vmatprep.subr.bf16.mxu1 %v7288_v35  ;;  %v7361_v34 = vld [vmem:[#allocation5 + $0x7a0] ss:$48 sps:$4 sm:$0xff]   ;;  %v7369_v35 = vld [vmem:[#allocation5 + $0x804] ss:$48 sps:$4 sm:$0xff]  }
 0x211   :  { %4365 = vmatpush1.bf16.msra.mxu0 %v7283_v36  ;;  %4529 = vmatpush1.bf16.msra.mxu1 %v7286_v37  ;;  %v7372_v36 = vld [vmem:[#allocation5 + $0x80c] ss:$48 sps:$4 sm:$0xff]   ;;  %v7367_v37 = vld [vmem:[#allocation5 + $0x800] ss:$48 sps:$4 sm:$0xff]  }
 0x212   :  { %4366 = vmatprep.subr.bf16.mxu0 %v7291_v38  ;;  %4530 = vmatprep.subr.bf16.mxu1 %v7294_v39  ;;  %v7370_v38 = vld [vmem:[#allocation5 + $0x808] ss:$48 sps:$4 sm:$0xff]   ;;  %v7375_v39 = vld [vmem:[#allocation5 + $0x864] ss:$48 sps:$4 sm:$0xff]  }
 0x215   :  { %4367 = vmatpush1.bf16.msra.mxu0 %v7289_v40  ;;  %4531 = vmatpush1.bf16.msra.mxu1 %v7292_v41  ;;  %v7378_v40 = vld [vmem:[#allocation5 + $0x86c] ss:$48 sps:$4 sm:$0xff]   ;;  %v7373_v41 = vld [vmem:[#allocation5 + $0x860] ss:$48 sps:$4 sm:$0xff]  }
 0x216   :  { %4368 = vmatprep.subr.bf16.mxu0 %v7297_v42  ;;  %4532 = vmatprep.subr.bf16.mxu1 %v7300_v43  ;;  %v7376_v42 = vld [vmem:[#allocation5 + $0x868] ss:$48 sps:$4 sm:$0xff]   ;;  %v7381_v43 = vld [vmem:[#allocation5 + $0x8c4] ss:$48 sps:$4 sm:$0xff]  }
 0x219   :  { %4369 = vmatpush1.bf16.msra.mxu0 %v7295_v44  ;;  %4533 = vmatpush1.bf16.msra.mxu1 %v7298_v45  ;;  %v7384_v44 = vld [vmem:[#allocation5 + $0x8cc] ss:$48 sps:$4 sm:$0xff]   ;;  %v7379_v45 = vld [vmem:[#allocation5 + $0x8c0] ss:$48 sps:$4 sm:$0xff]  }
 0x21a   :  { %4370 = vmatprep.subr.bf16.mxu0 %v7303_v46  ;;  %4534 = vmatprep.subr.bf16.mxu1 %v7306_v47  ;;  %v7382_v46 = vld [vmem:[#allocation5 + $0x8c8] ss:$48 sps:$4 sm:$0xff]   ;;  %v7387_v47 = vld [vmem:[#allocation5 + $0x924] ss:$48 sps:$4 sm:$0xff]  }
 0x21d   :  { %4371 = vmatpush1.bf16.msra.mxu0 %v7301_v49  ;;  %4535 = vmatpush1.bf16.msra.mxu1 %v7304_v50  ;;  %v7390_v49 = vld [vmem:[#allocation5 + $0x92c] ss:$48 sps:$4 sm:$0xff]   ;;  %v7385_v50 = vld [vmem:[#allocation5 + $0x920] ss:$48 sps:$4 sm:$0xff]  }
 0x21e   :  { %4372 = vmatprep.subr.bf16.mxu0 %v7309_v51  ;;  %4536 = vmatprep.subr.bf16.mxu1 %v7312_v52  ;;  %v7388_v51 = vld [vmem:[#allocation5 + $0x928] ss:$48 sps:$4 sm:$0xff]   ;;  %v7393_v52 = vld [vmem:[#allocation5 + $0x984] ss:$48 sps:$4 sm:$0xff]  }
 0x221   :  { %4373 = vmatpush1.bf16.msra.mxu0 %v7307_v53  ;;  %4537 = vmatpush1.bf16.msra.mxu1 %v7310_v54  ;;  %v7396_v53 = vld [vmem:[#allocation5 + $0x98c] ss:$48 sps:$4 sm:$0xff]   ;;  %v7391_v54 = vld [vmem:[#allocation5 + $0x980] ss:$48 sps:$4 sm:$0xff]  }
 0x222   :  { %4374 = vmatprep.subr.bf16.mxu0 %v7315_v55  ;;  %4538 = vmatprep.subr.bf16.mxu1 %v7318_v56  ;;  %v7394_v55 = vld [vmem:[#allocation5 + $0x988] ss:$48 sps:$4 sm:$0xff]   ;;  %v7399_v56 = vld [vmem:[#allocation5 + $0x9e4] ss:$48 sps:$4 sm:$0xff]  }
 0x225   :  { %4375 = vmatpush1.bf16.msra.mxu0 %v7313_v57  ;;  %4539 = vmatpush1.bf16.msra.mxu1 %v7316_v58  ;;  %v7402_v57 = vld [vmem:[#allocation5 + $0x9ec] ss:$48 sps:$4 sm:$0xff]   ;;  %v7397_v58 = vld [vmem:[#allocation5 + $0x9e0] ss:$48 sps:$4 sm:$0xff]  }
 0x226   :  { %4376 = vmatprep.subr.bf16.mxu0 %v7321_v59  ;;  %4540 = vmatprep.subr.bf16.mxu1 %v7324_v60  ;;  %v7400_v59 = vld [vmem:[#allocation5 + $0x9e8] ss:$48 sps:$4 sm:$0xff]   ;;  %v7405_v60 = vld [vmem:[#allocation5 + $0xa44] ss:$48 sps:$4 sm:$0xff]  }
 0x229   :  { %4377 = vmatpush1.bf16.msra.mxu0 %v7319_v61  ;;  %4541 = vmatpush1.bf16.msra.mxu1 %v7322_v62  ;;  %v7408_v61 = vld [vmem:[#allocation5 + $0xa4c] ss:$48 sps:$4 sm:$0xff]   ;;  %v7403_v62 = vld [vmem:[#allocation5 + $0xa40] ss:$48 sps:$4 sm:$0xff]  }
 0x22a   :  { %4378 = vmatprep.subr.bf16.mxu0 %v7327_v63  ;;  %4542 = vmatprep.subr.bf16.mxu1 %v7330_v0  ;;  %v7406_v63 = vld [vmem:[#allocation5 + $0xa48] ss:$48 sps:$4 sm:$0xff]   ;;  %v7411_v0 = vld [vmem:[#allocation5 + $0xaa4] ss:$48 sps:$4 sm:$0xff]  }
 0x22d   :  { %4379 = vmatpush1.bf16.msra.mxu0 %v7325_v1  ;;  %4543 = vmatpush1.bf16.msra.mxu1 %v7328_v2  ;;  %v7414_v1 = vld [vmem:[#allocation5 + $0xaac] ss:$48 sps:$4 sm:$0xff]   ;;  %v7409_v2 = vld [vmem:[#allocation5 + $0xaa0] ss:$48 sps:$4 sm:$0xff]  }
 0x22e   :  { %4380 = vmatprep.subr.bf16.mxu0 %v7333_v3  ;;  %4544 = vmatprep.subr.bf16.mxu1 %v7336_v4  ;;  %v7412_v3 = vld [vmem:[#allocation5 + $0xaa8] ss:$48 sps:$4 sm:$0xff]   ;;  %v7417_v4 = vld [vmem:[#allocation5 + $0xb04] ss:$48 sps:$4 sm:$0xff]  }
 0x231   :  { %4381 = vmatpush1.bf16.msra.mxu0 %v7331_v6  ;;  %4545 = vmatpush1.bf16.msra.mxu1 %v7334_v11  ;;  %v7420_v6 = vld [vmem:[#allocation5 + $0xb0c] ss:$48 sps:$4 sm:$0xff]   ;;  %v7415_v11 = vld [vmem:[#allocation5 + $0xb00] ss:$48 sps:$4 sm:$0xff]  }
 0x232   :  { %4391 = vmatprep.subr.bf16.mxu0 %v7339_v48  ;;  %4555 = vmatprep.subr.bf16.mxu1 %v7342_v13  ;;  %v7418_v48 = vld [vmem:[#allocation5 + $0xb08] ss:$48 sps:$4 sm:$0xff]   ;;  %v7423_v13 = vld [vmem:[#allocation5 + $0xb64] ss:$48 sps:$4 sm:$0xff]  }
 0x234   :  { %4383 = vmatmul.mubr.bf16.vlgmr.msra.gmra.mrb[8].mxu0 %v7876_v5  ;;  %4547 = vmatmul.mubr.bf16.vlgmr.msra.gmra.mrb[8].mxu1 %v7876_v5  ;;  %v7360_v5 = vld [vmem:[#allocation5 + $0x74c] ss:$48 sps:$4 sm:$0xff]  }
 0x235   :  { %4392 = vmatpush1.bf16.msra.mxu0 %v7337_v14  ;;  %4556 = vmatpush1.bf16.msra.mxu1 %v7340_v15  ;;  %v7426_v14 = vld [vmem:[#allocation5 + $0xb6c] ss:$48 sps:$4 sm:$0xff]   ;;  %v7421_v15 = vld [vmem:[#allocation5 + $0xb60] ss:$48 sps:$4 sm:$0xff]  }
 0x236   :  { %4393 = vmatprep.subr.bf16.mxu0 %v7345_v16  ;;  %4557 = vmatprep.subr.bf16.mxu1 %v7348_v18  ;;  %v7424_v16 = vld [vmem:[#allocation5 + $0xb68] ss:$48 sps:$4 sm:$0xff]   ;;  %v7429_v18 = vld [vmem:[#allocation5 + $0xbc4] ss:$48 sps:$4 sm:$0xff]  }
 0x237   :  { %4423 = vmatprep.mubr.bf16.mxu0 %v7880_v32  ;;  %4587 = vmatprep.mubr.bf16.mxu1 %v7880_v32  ;;  %v7364_v32 = vld [vmem:[#allocation5 + $0x7a8] ss:$48 sps:$4 sm:$0xff]  }
 0x239   :  { %4394 = vmatpush1.bf16.msra.mxu0 %v7343_v19  ;;  %4558 = vmatpush1.bf16.msra.mxu1 %v7346_v21  ;;  %v7432_v19 = vld [vmem:[#allocation5 + $0xbcc] ss:$48 sps:$4 sm:$0xff]   ;;  %v7427_v21 = vld [vmem:[#allocation5 + $0xbc0] ss:$48 sps:$4 sm:$0xff]  }
 0x23a   :  { %4395 = vmatprep.subr.bf16.mxu0 %v7351_v22  ;;  %4559 = vmatprep.subr.bf16.mxu1 %v7354_v23  ;;  %v7430_v22 = vld [vmem:[#allocation5 + $0xbc8] ss:$48 sps:$4 sm:$0xff]   ;;  %v7435_v23 = vld [vmem:[#allocation5 + $0xc24] ss:$48 sps:$4 sm:$0xff]  }
 0x23d   :  { %4396 = vmatpush1.bf16.msra.mxu0 %v7349_v24  ;;  %4560 = vmatpush1.bf16.msra.mxu1 %v7352_v26  ;;  %v7438_v24 = vld [vmem:[#allocation5 + $0xc2c] ss:$48 sps:$4 sm:$0xff]   ;;  %v7433_v26 = vld [vmem:[#allocation5 + $0xc20] ss:$48 sps:$4 sm:$0xff]  }
 0x23e   :  { %4397 = vmatprep.subr.bf16.mxu0 %v7357_v27  ;;  %4561 = vmatprep.subr.bf16.mxu1 %v7360_v5  ;;  %v7436_v27 = vld [vmem:[#allocation5 + $0xc28] ss:$48 sps:$4 sm:$0xff]   ;;  %v7441_v5 = vld [vmem:[#allocation5 + $0xc84] ss:$48 sps:$4 sm:$0xff]  }
 0x241   :  { %4398 = vmatpush1.bf16.msra.mxu0 %v7355_v29  ;;  %4562 = vmatpush1.bf16.msra.mxu1 %v7358_v30  ;;  %v7444_v29 = vld [vmem:[#allocation5 + $0xc8c] ss:$48 sps:$4 sm:$0xff]   ;;  %v7439_v30 = vld [vmem:[#allocation5 + $0xc80] ss:$48 sps:$4 sm:$0xff]  }
 0x242   :  { %4399 = vmatprep.subr.bf16.mxu0 %v7363_v31  ;;  %4563 = vmatprep.subr.bf16.mxu1 %v7366_v33  ;;  %v7442_v31 = vld [vmem:[#allocation5 + $0xc88] ss:$48 sps:$4 sm:$0xff]   ;;  %v7447_v33 = vld [vmem:[#allocation5 + $0xce4] ss:$48 sps:$4 sm:$0xff]  }
 0x245   :  { %4400 = vmatpush1.bf16.msra.mxu0 %v7361_v34  ;;  %4564 = vmatpush1.bf16.msra.mxu1 %v7364_v32  ;;  %v7450_v34 = vld [vmem:[#allocation5 + $0xcec] ss:$48 sps:$4 sm:$0xff]   ;;  %v7445_v32 = vld [vmem:[#allocation5 + $0xce0] ss:$48 sps:$4 sm:$0xff]  }
 0x246   :  { %4401 = vmatprep.subr.bf16.mxu0 %v7369_v35  ;;  %4565 = vmatprep.subr.bf16.mxu1 %v7372_v36  ;;  %v7448_v35 = vld [vmem:[#allocation5 + $0xce8] ss:$48 sps:$4 sm:$0xff]   ;;  %v7453_v36 = vld [vmem:[#allocation5 + $0xd44] ss:$48 sps:$4 sm:$0xff]  }
 0x249   :  { %4402 = vmatpush1.bf16.msra.mxu0 %v7367_v37  ;;  %4566 = vmatpush1.bf16.msra.mxu1 %v7370_v38  ;;  %v7451_v37 = vld [vmem:[#allocation5 + $0xd40] ss:$48 sps:$4 sm:$0xff]   ;;  %v7454_v38 = vld [vmem:[#allocation5 + $0xd48] ss:$48 sps:$4 sm:$0xff]  }
 0x24a   :  { %4403 = vmatprep.subr.bf16.mxu0 %v7375_v39  ;;  %4567 = vmatprep.subr.bf16.mxu1 %v7378_v40  ;;  %v7459_v39 = vld [vmem:[#allocation5 + $0xda4] ss:$48 sps:$4 sm:$0xff]   ;;  %v7462_v40 = vld [vmem:[#allocation5 + $0xdac] ss:$48 sps:$4 sm:$0xff]  }
 0x24d   :  { %4404 = vmatpush1.bf16.msra.mxu0 %v7373_v41  ;;  %4568 = vmatpush1.bf16.msra.mxu1 %v7376_v42  ;;  %v7457_v41 = vld [vmem:[#allocation5 + $0xda0] ss:$48 sps:$4 sm:$0xff]   ;;  %v7465_v42 = vld [vmem:[#allocation5 + $0xe04] ss:$48 sps:$4 sm:$0xff]  }
 0x24e   :  { %4405 = vmatprep.subr.bf16.mxu0 %v7381_v43  ;;  %4569 = vmatprep.subr.bf16.mxu1 %v7384_v44  ;;  %v7468_v43 = vld [vmem:[#allocation5 + $0xe0c] ss:$48 sps:$4 sm:$0xff]   ;;  %v7463_v44 = vld [vmem:[#allocation5 + $0xe00] ss:$48 sps:$4 sm:$0xff]  }
 0x251   :  { %4406 = vmatpush1.bf16.msra.mxu0 %v7379_v45  ;;  %4570 = vmatpush1.bf16.msra.mxu1 %v7382_v46  ;;  %v7466_v45 = vld [vmem:[#allocation5 + $0xe08] ss:$48 sps:$4 sm:$0xff]   ;;  %v7471_v46 = vld [vmem:[#allocation5 + $0xe64] ss:$48 sps:$4 sm:$0xff]  }
 0x252   :  { %4407 = vmatprep.subr.bf16.mxu0 %v7387_v47  ;;  %4571 = vmatprep.subr.bf16.mxu1 %v7390_v49  ;;  %v7474_v47 = vld [vmem:[#allocation5 + $0xe6c] ss:$48 sps:$4 sm:$0xff]   ;;  %v7469_v49 = vld [vmem:[#allocation5 + $0xe60] ss:$48 sps:$4 sm:$0xff]  }
 0x255   :  { %4408 = vmatpush1.bf16.msra.mxu0 %v7385_v50  ;;  %4572 = vmatpush1.bf16.msra.mxu1 %v7388_v51  ;;  %v7472_v50 = vld [vmem:[#allocation5 + $0xe68] ss:$48 sps:$4 sm:$0xff]   ;;  %v7477_v51 = vld [vmem:[#allocation5 + $0xec4] ss:$48 sps:$4 sm:$0xff]  }
 0x256   :  { %4409 = vmatprep.subr.bf16.mxu0 %v7393_v52  ;;  %4573 = vmatprep.subr.bf16.mxu1 %v7396_v53  ;;  %v7480_v52 = vld [vmem:[#allocation5 + $0xecc] ss:$48 sps:$4 sm:$0xff]   ;;  %v7475_v53 = vld [vmem:[#allocation5 + $0xec0] ss:$48 sps:$4 sm:$0xff]  }
 0x259   :  { %4410 = vmatpush1.bf16.msra.mxu0 %v7391_v54  ;;  %4574 = vmatpush1.bf16.msra.mxu1 %v7394_v55  ;;  %v7478_v54 = vld [vmem:[#allocation5 + $0xec8] ss:$48 sps:$4 sm:$0xff]   ;;  %v7483_v55 = vld [vmem:[#allocation5 + $0xf24] ss:$48 sps:$4 sm:$0xff]  }
 0x25a   :  { %4411 = vmatprep.subr.bf16.mxu0 %v7399_v56  ;;  %4575 = vmatprep.subr.bf16.mxu1 %v7402_v57  ;;  %v7486_v56 = vld [vmem:[#allocation5 + $0xf2c] ss:$48 sps:$4 sm:$0xff]   ;;  %v7481_v57 = vld [vmem:[#allocation5 + $0xf20] ss:$48 sps:$4 sm:$0xff]  }
 0x25d   :  { %4412 = vmatpush1.bf16.msra.mxu0 %v7397_v58  ;;  %4576 = vmatpush1.bf16.msra.mxu1 %v7400_v59  ;;  %v7484_v58 = vld [vmem:[#allocation5 + $0xf28] ss:$48 sps:$4 sm:$0xff]   ;;  %v7489_v59 = vld [vmem:[#allocation5 + $0xf84] ss:$48 sps:$4 sm:$0xff]  }
 0x25e   :  { %4413 = vmatprep.subr.bf16.mxu0 %v7405_v60  ;;  %4577 = vmatprep.subr.bf16.mxu1 %v7408_v61  ;;  %v7492_v60 = vld [vmem:[#allocation5 + $0xf8c] ss:$48 sps:$4 sm:$0xff]   ;;  %v7487_v61 = vld [vmem:[#allocation5 + $0xf80] ss:$48 sps:$4 sm:$0xff]  }
 0x261   :  { %4414 = vmatpush1.bf16.msra.mxu0 %v7403_v62  ;;  %4578 = vmatpush1.bf16.msra.mxu1 %v7406_v63  ;;  %v7490_v62 = vld [vmem:[#allocation5 + $0xf88] ss:$48 sps:$4 sm:$0xff]   ;;  %v7495_v63 = vld [vmem:[#allocation5 + $0xfe4] ss:$48 sps:$4 sm:$0xff]  }
 0x262   :  { %4415 = vmatprep.subr.bf16.mxu0 %v7411_v0  ;;  %4579 = vmatprep.subr.bf16.mxu1 %v7414_v1  ;;  %v7498_v0 = vld [vmem:[#allocation5 + $0xfec] ss:$48 sps:$4 sm:$0xff]   ;;  %v7493_v1 = vld [vmem:[#allocation5 + $0xfe0] ss:$48 sps:$4 sm:$0xff]  }
 0x265   :  { %4416 = vmatpush1.bf16.msra.mxu0 %v7409_v2  ;;  %4580 = vmatpush1.bf16.msra.mxu1 %v7412_v3  ;;  %v7496_v2 = vld [vmem:[#allocation5 + $0xfe8] ss:$48 sps:$4 sm:$0xff]   ;;  %v7501_v3 = vld [vmem:[#allocation5 + $0x1044] ss:$48 sps:$4 sm:$0xff]  }
 0x266   :  { %4417 = vmatprep.subr.bf16.mxu0 %v7417_v4  ;;  %4581 = vmatprep.subr.bf16.mxu1 %v7420_v6  ;;  %v7504_v4 = vld [vmem:[#allocation5 + $0x104c] ss:$48 sps:$4 sm:$0xff]   ;;  %v7499_v6 = vld [vmem:[#allocation5 + $0x1040] ss:$48 sps:$4 sm:$0xff]  }
 0x269   :  { %4418 = vmatpush1.bf16.msra.mxu0 %v7415_v11  ;;  %4582 = vmatpush1.bf16.msra.mxu1 %v7418_v48  ;;  %v7502_v11 = vld [vmem:[#allocation5 + $0x1048] ss:$48 sps:$4 sm:$0xff]   ;;  %v7507_v48 = vld [vmem:[#allocation5 + $0x10a4] ss:$48 sps:$4 sm:$0xff]  }
 0x26a   :  { %4419 = vmatprep.subr.bf16.mxu0 %v7423_v13  ;;  %4583 = vmatprep.subr.bf16.mxu1 %v7426_v14  ;;  %v7510_v13 = vld [vmem:[#allocation5 + $0x10ac] ss:$48 sps:$4 sm:$0xff]   ;;  %v7505_v14 = vld [vmem:[#allocation5 + $0x10a0] ss:$48 sps:$4 sm:$0xff]  }
 0x26d   :  { %4420 = vmatpush1.bf16.msra.mxu0 %v7421_v15  ;;  %4584 = vmatpush1.bf16.msra.mxu1 %v7424_v16  ;;  %v7508_v15 = vld [vmem:[#allocation5 + $0x10a8] ss:$48 sps:$4 sm:$0xff]   ;;  %v7513_v16 = vld [vmem:[#allocation5 + $0x1104] ss:$48 sps:$4 sm:$0xff]  }
 0x26e   :  { %4421 = vmatprep.subr.bf16.mxu0 %v7429_v18  ;;  %4585 = vmatprep.subr.bf16.mxu1 %v7432_v19  ;;  %v7516_v18 = vld [vmem:[#allocation5 + $0x110c] ss:$48 sps:$4 sm:$0xff]   ;;  %v7511_v19 = vld [vmem:[#allocation5 + $0x1100] ss:$48 sps:$4 sm:$0xff]  }
 0x271   :  { %4422 = vmatpush1.bf16.msra.mxu0 %v7427_v21  ;;  %4586 = vmatpush1.bf16.msra.mxu1 %v7430_v22  ;;  %v7514_v21 = vld [vmem:[#allocation5 + $0x1108] ss:$48 sps:$4 sm:$0xff]   ;;  %v7519_v22 = vld [vmem:[#allocation5 + $0x1164] ss:$48 sps:$4 sm:$0xff]  }
 0x272   :  { %4432 = vmatprep.subr.bf16.mxu0 %v7435_v23  ;;  %4596 = vmatprep.subr.bf16.mxu1 %v7438_v24  ;;  %v7522_v23 = vld [vmem:[#allocation5 + $0x116c] ss:$48 sps:$4 sm:$0xff]   ;;  %v690_v24 = vlaneseq }
 0x274   :  { %4424 = vmatmul.mubr.bf16.vlgmr.msra.gmra.mrb[8].mxu0 %v7884_v12  ;;  %4588 = vmatmul.mubr.bf16.vlgmr.msra.gmra.mrb[8].mxu1 %v7884_v12  ;;  %v7456_v12 = vld [vmem:[#allocation5 + $0xd4c] ss:$48 sps:$4 sm:$0xff]  }
 0x275   :  { %4433 = vmatpush1.bf16.msra.mxu0 %v7433_v26  ;;  %4597 = vmatpush1.bf16.msra.mxu1 %v7436_v27  ;;  %v7517_v26 = vld [vmem:[#allocation5 + $0x1160] ss:$48 sps:$4 sm:$0xff]   ;;  %v7520_v27 = vld [vmem:[#allocation5 + $0x1168] ss:$48 sps:$4 sm:$0xff]  }
 0x276   :  { %4434 = vmatprep.subr.bf16.mxu0 %v7441_v5  ;;  %4598 = vmatprep.subr.bf16.mxu1 %v7444_v29  ;;  %v7525_v5 = vld [vmem:[#allocation5 + $0x11c4] ss:$48 sps:$4 sm:$0xff]   ;;  %v7528_v29 = vld [vmem:[#allocation5 + $0x11cc] ss:$48 sps:$4 sm:$0xff]  }
 0x277   :  { %4464 = vmatprep.mubr.bf16.mxu0 %v7886_v17  ;;  %4628 = vmatprep.mubr.bf16.mxu1 %v7886_v17  ;;  %v7460_v17 = vld [vmem:[#allocation5 + $0xda8] ss:$48 sps:$4 sm:$0xff]  }
 0x279   :  { %4435 = vmatpush1.bf16.msra.mxu0 %v7439_v30  ;;  %4599 = vmatpush1.bf16.msra.mxu1 %v7442_v31  ;;  %v7940_v30 = vshrl.u32 %v690_v24, 7  ;;  %v7523_v31 = vld [vmem:[#allocation5 + $0x11c0] ss:$48 sps:$4 sm:$0xff]  }
 0x27a   :  { %4436 = vmatprep.subr.bf16.mxu0 %v7447_v33  ;;  %4600 = vmatprep.subr.bf16.mxu1 %v7450_v34  ;;  %v7526_v33 = vld [vmem:[#allocation5 + $0x11c8] ss:$48 sps:$4 sm:$0xff]   ;;  %v7531_v34 = vld [vmem:[#allocation5 + $0x1224] ss:$48 sps:$4 sm:$0xff]  }
 0x27d   :  { %4437 = vmatpush1.bf16.msra.mxu0 %v7445_v32  ;;  %4601 = vmatpush1.bf16.msra.mxu1 %v7448_v35  ;;  %v7534_v32 = vld [vmem:[#allocation5 + $0x122c] ss:$48 sps:$4 sm:$0xff]   ;;  %v696_v35 = vsub.s32 1, %v7940_v30 }
 0x27e   :  { %4438 = vmatprep.subr.bf16.mxu0 %v7453_v36  ;;  %4602 = vmatprep.subr.bf16.mxu1 %v7456_v12  ;;  %v704_v36 = vsub.s32 3, %v7940_v30  ;;  %v7944_v12 = vld [vmem:[#allocation7] sm:$0xff] }
 0x281   :  { %4439 = vmatpush1.bf16.msra.mxu0 %v7451_v37  ;;  %4603 = vmatpush1.bf16.msra.mxu1 %v7454_v38  ;;  %v7529_v37 = vld [vmem:[#allocation5 + $0x1220] ss:$48 sps:$4 sm:$0xff]   ;;  %v7532_v38 = vld [vmem:[#allocation5 + $0x1228] ss:$48 sps:$4 sm:$0xff]  }
 0x282   :  { %4440 = vmatprep.subr.bf16.mxu0 %v7459_v39  ;;  %4604 = vmatprep.subr.bf16.mxu1 %v7462_v40  ;;  %v7535_v39 = vld [vmem:[#allocation8 + $0x40] sm:$0xff]  }
 0x283   :  { %v7536_v40 = vld [vmem:[#allocation8 + $0xc0] sm:$0xff]  }
 0x285   :  { %4441 = vmatpush1.bf16.msra.mxu0 %v7457_v41  ;;  %4605 = vmatpush1.bf16.msra.mxu1 %v7460_v17  ;;  %v697_v41 = vrot.slane %v7944_v12, %v696_v35  ;;  %v705_v17 = vrot.slane %v7944_v12, %v704_v36 }
 0x286   :  { %4442 = vmatprep.subr.bf16.mxu0 %v7465_v42  ;;  %4606 = vmatprep.subr.bf16.mxu1 %v7468_v43 }
 0x287   :  { %v6559_v42 = vadd.f32 %v7928_v9, %v697_v41  ;;  %v6561_v43 = vadd.f32 %v7930_v10, %v705_v17  ;;  %v7541_v9 = vld [vmem:[#allocation8 + $0x8] sm:$0xff]   ;;  %v7565_v17 = vld [vmem:[#allocation8 + $0x38] sm:$0xff]  }
 0x288   :  { %v7542_v10 = vld [vmem:[#allocation8 + $0x88] sm:$0xff]  }
 0x289   :  { %4443 = vmatpush1.bf16.msra.mxu0 %v7463_v44  ;;  %4607 = vmatpush1.bf16.msra.mxu1 %v7466_v45  ;;  %v4679_v44 = vmax.f32 %v6559_v42, 0.0  ;;  %v4681_v45 = vmax.f32 %v6561_v43, 0.0  ;;  %v7566_v42 = vld [vmem:[#allocation8 + $0xb8] sm:$0xff]  }
 0x28a   :  { %4444 = vmatprep.subr.bf16.mxu0 %v7471_v46  ;;  %4608 = vmatprep.subr.bf16.mxu1 %v7474_v47  ;;  %v7537_v46 = vld [vmem:[#allocation8] sm:$0xff]  }
 0x28b   :  { %v7538_v47 = vld [vmem:[#allocation8 + $0x80] sm:$0xff]  }
 0x28d   :  { %4445 = vmatpush1.bf16.msra.mxu0 %v7469_v49  ;;  %4609 = vmatpush1.bf16.msra.mxu1 %v7472_v50  ;;  %v7539_v49 = vld [vmem:[#allocation8 + $0x48] sm:$0xff]  }
 0x28e   :  { %4446 = vmatprep.subr.bf16.mxu0 %v7477_v51  ;;  %4610 = vmatprep.subr.bf16.mxu1 %v7480_v52  ;;  %v7540_v50 = vld [vmem:[#allocation8 + $0xc8] sm:$0xff]   ;;  %v4691_v51 = vpack.c.bf16 %v4679_v44, %v4679_v44  ;;  %v7543_v52 = vld [vmem:[#allocation8 + $0x50] sm:$0xff]  }
 0x291   :  { %4447 = vmatpush1.bf16.msra.mxu0 %v7475_v53  ;;  %4611 = vmatpush1.bf16.msra.mxu1 %v7478_v54  ;;  %v7544_v53 = vld [vmem:[#allocation8 + $0xd0] sm:$0xff]  }
 0x292   :  { %4448 = vmatprep.subr.bf16.mxu0 %v7483_v55  ;;  %4612 = vmatprep.subr.bf16.mxu1 %v7486_v56  ;;  %v7545_v55 = vld [vmem:[#allocation8 + $0x10] sm:$0xff]  }
 0x293   :  { %v7546_v56 = vld [vmem:[#allocation8 + $0x90] sm:$0xff]  }
 0x295   :  { %4449 = vmatpush1.bf16.msra.mxu0 %v7481_v57  ;;  %4613 = vmatpush1.bf16.msra.mxu1 %v7484_v58  ;;  %v7548_v57 = vld [vmem:[#allocation8 + $0xd8] sm:$0xff]  }
 0x296   :  { %4450 = vmatprep.subr.bf16.mxu0 %v7489_v59  ;;  %4614 = vmatprep.subr.bf16.mxu1 %v7492_v60 }
 0x299   :  { %4451 = vmatpush1.bf16.msra.mxu0 %v7487_v61  ;;  %4615 = vmatpush1.bf16.msra.mxu1 %v7490_v62 }
 0x29a   :  { %4452 = vmatprep.subr.bf16.mxu0 %v7495_v63  ;;  %4616 = vmatprep.subr.bf16.mxu1 %v7498_v0 }
 0x29d   :  { %4453 = vmatpush1.bf16.msra.mxu0 %v7493_v1  ;;  %4617 = vmatpush1.bf16.msra.mxu1 %v7496_v2  ;;  %v7549_v1 = vld [vmem:[#allocation8 + $0x18] sm:$0xff]  }
 0x29e   :  { %4454 = vmatprep.subr.bf16.mxu0 %v7501_v3  ;;  %4618 = vmatprep.subr.bf16.mxu1 %v7504_v4  ;;  %v7550_v2 = vld [vmem:[#allocation8 + $0x98] sm:$0xff]  }
 0x2a1   :  { %4455 = vmatpush1.bf16.msra.mxu0 %v7499_v6  ;;  %4619 = vmatpush1.bf16.msra.mxu1 %v7502_v11  ;;  %v7551_v6 = vld [vmem:[#allocation8 + $0x60] sm:$0xff]  }
 0x2a2   :  { %4456 = vmatprep.subr.bf16.mxu0 %v7507_v48  ;;  %4620 = vmatprep.subr.bf16.mxu1 %v7510_v13  ;;  %v7552_v11 = vld [vmem:[#allocation8 + $0xe0] sm:$0xff]  }
 0x2a3   :  { %v7553_v48 = vld [vmem:[#allocation8 + $0x20] sm:$0xff]  }
 0x2a4   :  { %v7554_v13 = vld [vmem:[#allocation8 + $0xa0] sm:$0xff]  }
 0x2a5   :  { %4457 = vmatpush1.bf16.msra.mxu0 %v7505_v14  ;;  %4621 = vmatpush1.bf16.msra.mxu1 %v7508_v15  ;;  %v692_v14 = vsub.s32 0, %v7940_v30  ;;  %v700_v15 = vsub.s32 2, %v7940_v30 }
 0x2a6   :  { %4458 = vmatprep.subr.bf16.mxu0 %v7513_v16  ;;  %4622 = vmatprep.subr.bf16.mxu1 %v7516_v18  ;;  %v7555_v16 = vld [vmem:[#allocation8 + $0x68] sm:$0xff]  }
 0x2a7   :  { %v7556_v18 = vld [vmem:[#allocation8 + $0xe8] sm:$0xff]   ;;  %v693_v24 = vrot.slane %v7944_v12, %v692_v14 }
 0x2a9   :  { %4459 = vmatpush1.bf16.msra.mxu0 %v7511_v19  ;;  %4623 = vmatpush1.bf16.msra.mxu1 %v7514_v21  ;;  %v712_v19 = vsub.s32 5, %v7940_v30  ;;  %v720_v21 = vsub.s32 7, %v7940_v30 }
 0x2aa   :  { %4460 = vmatprep.subr.bf16.mxu0 %v7519_v22  ;;  %4624 = vmatprep.subr.bf16.mxu1 %v7522_v23  ;;  %v7557_v22 = vld [vmem:[#allocation8 + $0x28] sm:$0xff]  }
 0x2ab   :  { %v7558_v23 = vld [vmem:[#allocation8 + $0xa8] sm:$0xff]  }
 0x2ad   :  { %4461 = vmatpush1.bf16.msra.mxu0 %v7517_v26  ;;  %4625 = vmatpush1.bf16.msra.mxu1 %v7520_v27  ;;  %v701_v26 = vrot.slane %v7944_v12, %v700_v15  ;;  %v7559_v27 = vld [vmem:[#allocation8 + $0x70] sm:$0xff]  }
 0x2ae   :  { %4462 = vmatprep.subr.bf16.mxu0 %v7525_v5  ;;  %4626 = vmatprep.subr.bf16.mxu1 %v7528_v29  ;;  %v7560_v5 = vld [vmem:[#allocation8 + $0xf0] sm:$0xff]   ;;  %v713_v29 = vrot.slane %v7944_v12, %v712_v19 }
 0x2af   :  { %v7593_v19 = vld [vmem:[#allocation8 + $0x130] sm:$0xff]  }
 0x2b1   :  { %4463 = vmatpush1.bf16.msra.mxu0 %v7523_v31  ;;  %4627 = vmatpush1.bf16.msra.mxu1 %v7526_v33  ;;  %v721_v31 = vrot.slane %v7944_v12, %v720_v21  ;;  %v7561_v33 = vld [vmem:[#allocation8 + $0x30] sm:$0xff]  }
 0x2b2   :  { %4473 = vmatprep.subr.bf16.mxu0 %v7531_v34  ;;  %4637 = vmatprep.subr.bf16.mxu1 %v7534_v32  ;;  %v7562_v34 = vld [vmem:[#allocation8 + $0xb0] sm:$0xff]   ;;  %v6558_v32 = vadd.f32 %v7924_v7, %v693_v24  ;;  %v7596_v24 = vld [vmem:[#allocation8 + $0x1f8] sm:$0xff]  }
 0x2b4   :  { %4465 = vmatmul.mubr.bf16.vlgmr.msra.gmra.mrb[8].mxu0 %v7892_v20  ;;  %4629 = vmatmul.mubr.bf16.vlgmr.msra.gmra.mrb[8].mxu1 %v7892_v20  ;;  %v4693_v20 = vpack.c.bf16 %v4681_v45, %v4681_v45  ;;  %v4678_v43 = vmax.f32 %v6558_v32, 0.0  ;;  %v7567_v45 = vld [vmem:[#allocation8 + $0x140] sm:$0xff]   ;;  %v7603_v32 = vld [vmem:[#allocation8 + $0x248] sm:$0xff]  }
 0x2b5   :  { %4474 = vmatpush1.bf16.msra.mxu0 %v7529_v37  ;;  %4638 = vmatpush1.bf16.msra.mxu1 %v7532_v38  ;;  %v6560_v37 = vadd.f32 %v7926_v8, %v701_v26  ;;  %v7563_v38 = vld [vmem:[#allocation8 + $0x78] sm:$0xff]   ;;  %v7569_v8 = vld [vmem:[#allocation8 + $0x100] sm:$0xff]  }
 0x2b6   :  { %4505 = vmatprep.mubr.bf16.mxu0 %v7780_v25  ;;  %4669 = vmatprep.mubr.bf16.mxu1 %v7780_v25  ;;  %v716_v25 = vsub.s32 6, %v7940_v30  ;;  %v7597_v26 = vld [vmem:[#allocation8 + $0x138] sm:$0xff]  }
 0x2b7   :  { %6426 = vmatprep.subr.bf16.mxu0 %v7535_v39  ;;  %6448 = vmatprep.subr.bf16.mxu1 %v7536_v40  ;;  %v7564_v39 = vld [vmem:[#allocation8 + $0xf8] sm:$0xff]   ;;  %v4680_v44 = vmax.f32 %v6560_v37, 0.0 }
 0x2b8   :  { %v717_v54 = vrot.slane %v7944_v12, %v716_v25  ;;  %v7571_v25 = vld [vmem:[#allocation8 + $0x148] sm:$0xff]  }
 0x2c0   :  { %6327 = vmatmul.mubr.msk.bf16.vlgmr.msra.gmra.mrb[8].mxu0 %vm3690_vm0, %v7898_v28  ;;  %6328 = vmatmul.mubr.msk.bf16.vlgmr.msra.gmra.mrb[8].mxu1 %vm3690_vm0, %v7898_v28  ;;  %v7547_v28 = vld [vmem:[#allocation8 + $0x58] sm:$0xff]  }
 0x2c1   :  { %6427 = vmatpush3.bf16.msra.mxu0 %v7537_v46  ;;  %6449 = vmatpush3.bf16.msra.mxu1 %v7538_v47  ;;  %v7568_v46 = vld [vmem:[#allocation8 + $0x1c0] sm:$0xff]  }
 0x2c2   :  { %5509 = vmatprep.mubr.bf16.mxu0 %v4691_v51  ;;  %5549 = vmatprep.mubr.bf16.mxu1 %v4693_v20  ;;  %v7570_v51 = vld [vmem:[#allocation8 + $0x180] sm:$0xff]  }
 0x2c3   :  { %6428 = vmatprep.subr.bf16.mxu0 %v7539_v49  ;;  %6450 = vmatprep.subr.bf16.mxu1 %v7540_v50  ;;  %v4690_v49 = vpack.c.bf16 %v4678_v43, %v4678_v43  ;;  %v4692_v50 = vpack.c.bf16 %v4680_v44, %v4680_v44  ;;  %v7611_v43 = vld [vmem:[#allocation8 + $0x258] sm:$0xff]  }
 0x2c4   :  { %v7612_v44 = vld [vmem:[#allocation8 + $0x2d8] sm:$0xff]  }
 0x2c5   :  { %6429 = vmatpush3.bf16.msra.mxu0 %v7541_v9  ;;  %6451 = vmatpush3.bf16.msra.mxu1 %v7542_v10  ;;  %v7572_v9 = vld [vmem:[#allocation8 + $0x1c8] sm:$0xff]  }
 0x2c6   :  { %6430 = vmatprep.subr.bf16.mxu0 %v7543_v52  ;;  %6452 = vmatprep.subr.bf16.mxu1 %v7544_v53  ;;  %v7573_v52 = vld [vmem:[#allocation8 + $0x108] sm:$0xff]  }
 0x2c7   :  { %v7964_v58 = vpop.f32.mrb[4].mxu0  ;;  %v4343_v59 = vpop.f32.mrb[4].mxu1  ;;  %v7574_v53 = vld [vmem:[#allocation8 + $0x188] sm:$0xff]  }
 0x2c8   :  { %v7966_v60 = vadd.f32 %v4343_v59, %v717_v54  ;;  %v4181_v61 = vpop.f32.mrb[5].mxu0  ;;  %v4345_v62 = vpop.f32.mrb[5].mxu1  ;;  %v7575_v54 = vld [vmem:[#allocation8 + $0x150] sm:$0xff]   ;;  %v7580_v59 = vld [vmem:[#allocation8 + $0x1d8] sm:$0xff]  }
 0x2c9   :  { %6431 = vmatpush3.bf16.msra.mxu0 %v7545_v55  ;;  %6453 = vmatpush3.bf16.msra.mxu1 %v7546_v56  ;;  %v4183_v63 = vpop.f32.mrb[6].mxu0  ;;  %v4347_v0 = vpop.f32.mrb[6].mxu1  ;;  %v6563_v40 = vadd.f32 %v4181_v61, %v713_v29  ;;  %v6565_v41 = vadd.f32 %v4345_v62, %v721_v31  ;;  %v7576_v55 = vld [vmem:[#allocation8 + $0x1d0] sm:$0xff]   ;;  %v7581_v61 = vld [vmem:[#allocation8 + $0x118] sm:$0xff]   ;;  %v7600_v31 = vld [vmem:[#allocation8 + $0x2c0] sm:$0xff]  }
 0x2ca   :  { %v4184_v3 = vpop.f32.mrb[7].mxu0  ;;  %v4348_v4 = vpop.f32.mrb[7].mxu1  ;;  %6432 = vmatprep.subr.bf16.mxu0 %v7547_v28  ;;  %6454 = vmatprep.subr.bf16.mxu1 %v7548_v57  ;;  %v7577_v56 = vld [vmem:[#allocation8 + $0x110] sm:$0xff]   ;;  %v7579_v57 = vld [vmem:[#allocation8 + $0x158] sm:$0xff]   ;;  %v7583_v63 = vld [vmem:[#allocation8 + $0x160] sm:$0xff]   ;;  %v4684_v29 = vmax.f32 %v7966_v60, 0.0 }
 0x2cb   :  { %v4683_v47 = vmax.f32 %v6563_v40, 0.0  ;;  %v4685_v7 = vmax.f32 %v6565_v41, 0.0  ;;  %v7578_v28 = vld [vmem:[#allocation8 + $0x190] sm:$0xff]   ;;  %v7582_v62 = vld [vmem:[#allocation8 + $0x198] sm:$0xff]   ;;  %v7584_v0 = vld [vmem:[#allocation8 + $0x1e0] sm:$0xff]  }
 0x2cc   :  { %v7586_v3 = vld [vmem:[#allocation8 + $0x1a0] sm:$0xff]   ;;  %v7587_v4 = vld [vmem:[#allocation8 + $0x168] sm:$0xff]   ;;  %v4696_v37 = vpack.c.bf16 %v4684_v29, %v4684_v29  ;;  %v7607_v60 = vld [vmem:[#allocation8 + $0x250] sm:$0xff]  }
 0x2cd   :  { %6433 = vmatpush3.bf16.msra.mxu0 %v7549_v1  ;;  %6455 = vmatpush3.bf16.msra.mxu1 %v7550_v2  ;;  %v4695_v20 = vpack.c.bf16 %v4683_v47, %v4683_v47  ;;  %v4697_v10 = vpack.c.bf16 %v4685_v7, %v4685_v7  ;;  %v7585_v1 = vld [vmem:[#allocation8 + $0x120] sm:$0xff]   ;;  %v708_v2 = vsub.s32 4, %v7940_v30  ;;  %v7606_v40 = vld [vmem:[#allocation8 + $0x288] sm:$0xff]   ;;  %v7608_v41 = vld [vmem:[#allocation8 + $0x2d0] sm:$0xff]  }
 0x2ce   :  { %6434 = vmatprep.subr.bf16.mxu0 %v7551_v6  ;;  %6456 = vmatprep.subr.bf16.mxu1 %v7552_v11  ;;  %v7588_v6 = vld [vmem:[#allocation8 + $0x1e8] sm:$0xff]   ;;  %v7615_v47 = vld [vmem:[#allocation8 + $0x260] sm:$0xff]  }
 0x2cf   :  { %v7589_v11 = vld [vmem:[#allocation8 + $0x128] sm:$0xff]   ;;  %v7616_v7 = vld [vmem:[#allocation8 + $0x2e0] sm:$0xff]  }
 0x2d1   :  { %6435 = vmatpush3.bf16.msra.mxu0 %v7553_v48  ;;  %6457 = vmatpush3.bf16.msra.mxu1 %v7554_v13  ;;  %v709_v48 = vrot.slane %v7944_v12, %v708_v2  ;;  %v7590_v13 = vld [vmem:[#allocation8 + $0x1a8] sm:$0xff]   ;;  %v7598_v12 = vld [vmem:[#allocation8 + $0x1b8] sm:$0xff]  }
 0x2d2   :  { %6436 = vmatprep.subr.bf16.mxu0 %v7555_v16  ;;  %6458 = vmatprep.subr.bf16.mxu1 %v7556_v18  ;;  %v7591_v16 = vld [vmem:[#allocation8 + $0x170] sm:$0xff]  }
 0x2d3   :  { %v7592_v18 = vld [vmem:[#allocation8 + $0x1f0] sm:$0xff]   ;;  %v6562_v21 = vadd.f32 %v7964_v58, %v709_v48 }
 0x2d5   :  { %6437 = vmatpush3.bf16.msra.mxu0 %v7557_v22  ;;  %6459 = vmatpush3.bf16.msra.mxu1 %v7558_v23  ;;  %v7594_v22 = vld [vmem:[#allocation8 + $0x1b0] sm:$0xff]   ;;  %v7595_v23 = vld [vmem:[#allocation8 + $0x178] sm:$0xff]  }
 0x2d6   :  { %6438 = vmatprep.subr.bf16.mxu0 %v7559_v27  ;;  %6460 = vmatprep.subr.bf16.mxu1 %v7560_v5  ;;  %v4682_v27 = vmax.f32 %v6562_v21, 0.0  ;;  %v7599_v5 = vld [vmem:[#allocation8 + $0x240] sm:$0xff]  }
 0x2d8   :  { %v4694_v58 = vpack.c.bf16 %v4682_v27, %v4682_v27  ;;  %v6329_v27 = vld [vmem:[#allocation10] ss:$0 sm:$0xff] }
 0x2d9   :  { %6439 = vmatpush3.bf16.msra.mxu0 %v7561_v33  ;;  %6461 = vmatpush3.bf16.msra.mxu1 %v7562_v34  ;;  %v7601_v33 = vld [vmem:[#allocation8 + $0x200] sm:$0xff]  }
 0x2da   :  { %6440 = vmatprep.subr.bf16.mxu0 %v7563_v38  ;;  %6462 = vmatprep.subr.bf16.mxu1 %v7564_v39  ;;  %v7602_v34 = vld [vmem:[#allocation8 + $0x280] sm:$0xff]   ;;  %v7604_v38 = vld [vmem:[#allocation8 + $0x2c8] sm:$0xff]  }
 0x2db   :  { %v7605_v39 = vld [vmem:[#allocation8 + $0x208] sm:$0xff]  }
 0x2dd   :  { %6441 = vmatpush3.bf16.msra.mxu0 %v7565_v17  ;;  %6463 = vmatpush3.bf16.msra.mxu1 %v7566_v42  ;;  %v7609_v17 = vld [vmem:[#allocation8 + $0x210] sm:$0xff]  }
 0x2de   :  { %6470 = vmatprep.subr.bf16.mxu0 %v7567_v45  ;;  %6492 = vmatprep.subr.bf16.mxu1 %v7568_v46  ;;  %v7610_v42 = vld [vmem:[#allocation8 + $0x290] sm:$0xff]   ;;  %v7613_v45 = vld [vmem:[#allocation8 + $0x218] sm:$0xff]  }
 0x2df   :  { %v7614_v46 = vld [vmem:[#allocation8 + $0x298] sm:$0xff]  }
 0x2e0   :  { %5510 = vmatmul.mubr.bf16.vlgmr.msra.gmra.mrb[12].mxu0 %v4690_v49  ;;  %5550 = vmatmul.mubr.bf16.vlgmr.msra.gmra.mrb[12].mxu1 %v4692_v50  ;;  %v7618_v49 = vld [vmem:[#allocation8 + $0x2a0] sm:$0xff]   ;;  %v7619_v50 = vld [vmem:[#allocation8 + $0x268] sm:$0xff]  }
 0x2e1   :  { %6471 = vmatpush3.bf16.msra.mxu0 %v7569_v8  ;;  %5589 = vmatprep.mubr.bf16.mxu0 %v4695_v20  ;;  %v7617_v8 = vld [vmem:[#allocation8 + $0x220] sm:$0xff]   ;;  %v7621_v20 = vld [vmem:[#allocation8 + $0x228] sm:$0xff]  }
 0x2e2   :  { %6493 = vmatpush3.bf16.msra.mxu1 %v7570_v51  ;;  %5629 = vmatprep.mubr.bf16.mxu1 %v4697_v10  ;;  %v7620_v51 = vld [vmem:[#allocation8 + $0x2e8] sm:$0xff]   ;;  %v7624_v10 = vld [vmem:[#allocation8 + $0x2f0] sm:$0xff]  }
 0x2e3   :  { %6472 = vmatprep.subr.bf16.mxu0 %v7571_v25  ;;  %6494 = vmatprep.subr.bf16.mxu1 %v7572_v9  ;;  %v7622_v25 = vld [vmem:[#allocation8 + $0x2a8] sm:$0xff]   ;;  %v7623_v9 = vld [vmem:[#allocation8 + $0x270] sm:$0xff]  }
 0x2e5   :  { %6473 = vmatpush3.bf16.msra.mxu0 %v7573_v52  ;;  %v7625_v52 = vld [vmem:[#allocation8 + $0x230] sm:$0xff]  }
 0x2e6   :  { %6495 = vmatpush3.bf16.msra.mxu1 %v7574_v53  ;;  %6474 = vmatprep.subr.bf16.mxu0 %v7575_v54  ;;  %v7626_v53 = vld [vmem:[#allocation8 + $0x2b0] sm:$0xff]   ;;  %v7627_v54 = vld [vmem:[#allocation8 + $0x278] sm:$0xff]  }
 0x2e7   :  { %6496 = vmatprep.subr.bf16.mxu1 %v7576_v55  ;;  %v7628_v55 = vld [vmem:[#allocation8 + $0x2f8] sm:$0xff]  }
 0x2e9   :  { %6475 = vmatpush3.bf16.msra.mxu0 %v7577_v56  ;;  %v7629_v56 = vld [vmem:[#allocation8 + $0x238] sm:$0xff]  }
 0x2ea   :  { %6497 = vmatpush3.bf16.msra.mxu1 %v7578_v28  ;;  %6476 = vmatprep.subr.bf16.mxu0 %v7579_v57  ;;  %v7630_v28 = vld [vmem:[#allocation8 + $0x2b8] sm:$0xff]  }
 0x2eb   :  { %6498 = vmatprep.subr.bf16.mxu1 %v7580_v59  ;;  %v687_v57 = vld [vmem:[#allocation7 + $0x8] sm:$0xf] }
 0x2ec   :  { %v725_v59 = vrot.slane %v687_v57, %v692_v14 }
 0x2ed   :  { %6477 = vmatpush3.bf16.msra.mxu0 %v7581_v61  ;;  %v733_v61 = vrot.slane %v687_v57, %v700_v15 }
 0x2ee   :  { %6499 = vmatpush3.bf16.msra.mxu1 %v7582_v62  ;;  %6478 = vmatprep.subr.bf16.mxu0 %v7583_v63  ;;  %v729_v62 = vrot.slane %v687_v57, %v696_v35  ;;  %v737_v63 = vrot.slane %v687_v57, %v704_v36 }
 0x2ef   :  { %6500 = vmatprep.subr.bf16.mxu1 %v7584_v0 }
 0x2f1   :  { %6479 = vmatpush3.bf16.msra.mxu0 %v7585_v1 }
 0x2f2   :  { %6501 = vmatpush3.bf16.msra.mxu1 %v7586_v3  ;;  %6480 = vmatprep.subr.bf16.mxu0 %v7587_v4 }
 0x2f3   :  { %6502 = vmatprep.subr.bf16.mxu1 %v7588_v6 }
 0x2f5   :  { %6481 = vmatpush3.bf16.msra.mxu0 %v7589_v11 }
 0x2f6   :  { %6503 = vmatpush3.bf16.msra.mxu1 %v7590_v13  ;;  %6482 = vmatprep.subr.bf16.mxu0 %v7591_v16 }
 0x2f7   :  { %6504 = vmatprep.subr.bf16.mxu1 %v7592_v18 }
 0x2f9   :  { %6483 = vmatpush3.bf16.msra.mxu0 %v7593_v19 }
 0x2fa   :  { %6505 = vmatpush3.bf16.msra.mxu1 %v7594_v22  ;;  %6484 = vmatprep.subr.bf16.mxu0 %v7595_v23 }
 0x2fb   :  { %6506 = vmatprep.subr.bf16.mxu1 %v7596_v24 }
 0x2fd   :  { %6485 = vmatpush3.bf16.msra.mxu0 %v7597_v26 }
 0x2fe   :  { %6507 = vmatpush3.bf16.msra.mxu1 %v7598_v12  ;;  %6514 = vmatprep.subr.bf16.mxu0 %v7599_v5 }
 0x2ff   :  { %6536 = vmatprep.subr.bf16.mxu1 %v7600_v31 }
 0x300   :  { %5590 = vmatmul.mubr.bf16.vlgmr.msra.gmra.mrb[16].mxu0 %v4694_v58 }
 0x301   :  { %5630 = vmatmul.mubr.bf16.vlgmr.msra.gmra.mrb[16].mxu1 %v4696_v37  ;;  %6515 = vmatpush3.bf16.msra.mxu0 %v7601_v33 }
 0x302   :  { %6537 = vmatpush3.bf16.msra.mxu1 %v7602_v34  ;;  %6516 = vmatprep.subr.bf16.mxu0 %v7603_v32 }
 0x303   :  { %6538 = vmatprep.subr.bf16.mxu1 %v7604_v38 }
 0x305   :  { %6517 = vmatpush3.bf16.msra.mxu0 %v7605_v39 }
 0x306   :  { %6539 = vmatpush3.bf16.msra.mxu1 %v7606_v40  ;;  %6518 = vmatprep.subr.bf16.mxu0 %v7607_v60 }
 0x307   :  { %6540 = vmatprep.subr.bf16.mxu1 %v7608_v41 }
 0x309   :  { %6519 = vmatpush3.bf16.msra.mxu0 %v7609_v17 }
 0x30a   :  { %6541 = vmatpush3.bf16.msra.mxu1 %v7610_v42  ;;  %6520 = vmatprep.subr.bf16.mxu0 %v7611_v43 }
 0x30b   :  { %6542 = vmatprep.subr.bf16.mxu1 %v7612_v44 }
 0x30d   :  { %6521 = vmatpush3.bf16.msra.mxu0 %v7613_v45 }
 0x30e   :  { %6543 = vmatpush3.bf16.msra.mxu1 %v7614_v46  ;;  %6522 = vmatprep.subr.bf16.mxu0 %v7615_v47 }
 0x30f   :  { %6544 = vmatprep.subr.bf16.mxu1 %v7616_v7 }
 0x311   :  { %6523 = vmatpush3.bf16.msra.mxu0 %v7617_v8 }
 0x312   :  { %6545 = vmatpush3.bf16.msra.mxu1 %v7618_v49  ;;  %6524 = vmatprep.subr.bf16.mxu0 %v7619_v50 }
 0x313   :  { %6546 = vmatprep.subr.bf16.mxu1 %v7620_v51 }
 0x315   :  { %6525 = vmatpush3.bf16.msra.mxu0 %v7621_v20 }
 0x316   :  { %6547 = vmatpush3.bf16.msra.mxu1 %v7622_v25  ;;  %6526 = vmatprep.subr.bf16.mxu0 %v7623_v9 }
 0x317   :  { %6548 = vmatprep.subr.bf16.mxu1 %v7624_v10 }
 0x319   :  { %6527 = vmatpush3.bf16.msra.mxu0 %v7625_v52 }
 0x31a   :  { %6549 = vmatpush3.bf16.msra.mxu1 %v7626_v53  ;;  %6528 = vmatprep.subr.bf16.mxu0 %v7627_v54 }
 0x31b   :  { %6550 = vmatprep.subr.bf16.mxu1 %v7628_v55 }
 0x31d   :  { %6529 = vmatpush3.bf16.msra.mxu0 %v7629_v56 }
 0x31e   :  { %6551 = vmatpush3.bf16.msra.mxu1 %v7630_v28 }
 0x393   :  { %v4507_v0 = vpop.f32.mrb[8].mxu0  ;;  %v4671_v1 = vpop.f32.mrb[8].mxu1 }
 0x394   :  { %v6566_v2 = vadd.f32 %v4507_v0, %v725_v59  ;;  %v6568_v3 = vadd.f32 %v4671_v1, %v733_v61  ;;  %v4509_v4 = vpop.f32.mrb[9].mxu0  ;;  %v4673_v6 = vpop.f32.mrb[9].mxu1 }
 0x395   :  { %v6567_v11 = vadd.f32 %v4509_v4, %v729_v62  ;;  %v6569_v48 = vadd.f32 %v4673_v6, %v737_v63  ;;  %v4511_v13 = vpop.f32.mrb[10].mxu0  ;;  %v4675_v16 = vpop.f32.mrb[10].mxu1 }
 0x396   :  { %v4686_v14 = vmax.f32 %v6566_v2, 0.0  ;;  %v4688_v18 = vmax.f32 %v6568_v3, 0.0  ;;  %v4512_v19 = vpop.f32.mrb[11].mxu0  ;;  %v4676_v15 = vpop.f32.mrb[11].mxu1 }
 0x397   :  { %v4687_v21 = vmax.f32 %v6567_v11, 0.0  ;;  %v4689_v22 = vmax.f32 %v6569_v48, 0.0 }
 0x398   :  { %v4698_v30 = vpack.c.bf16 %v4686_v14, %v4686_v14  ;;  %v4700_v36 = vpack.c.bf16 %v4688_v18, %v4688_v18 }
 0x399   :  { %v4699_v35 = vpack.c.bf16 %v4687_v21, %v4687_v21  ;;  %v4701_v23 = vpack.c.bf16 %v4689_v22, %v4689_v22 }
 0x39b   :  { %5669 = vmatprep.mubr.bf16.mxu0 %v4699_v35  ;;  %5709 = vmatprep.mubr.bf16.mxu1 %v4701_v23 }
 0x39c   :  { %5670 = vmatmul.mubr.bf16.vlgmr.msra.gmra.mrb[20].mxu0 %v4698_v30  ;;  %5710 = vmatmul.mubr.bf16.vlgmr.msra.gmra.mrb[20].mxu1 %v4700_v36 }
 0x3b3   :  { %v6442_v24 = vpop.f32.mrb[12].mxu0  ;;  %v6464_v26 = vpop.f32.mrb[12].mxu1 }
 0x3b4   :  { %v6443_v12 = vpop.f32.mrb[13].mxu0  ;;  %v6465_v5 = vpop.f32.mrb[13].mxu1 }
 0x3b5   :  { %v6444_v29 = vadd.f32 %v6443_v12, %v6442_v24  ;;  %v6466_v31 = vadd.f32 %v6465_v5, %v6464_v26  ;;  %v6445_v33 = vpop.f32.mrb[14].mxu0  ;;  %v6467_v58 = vpop.f32.mrb[14].mxu1 }
 0x3b6   :  { %v6446_v34 = vpop.f32.mrb[15].mxu0  ;;  %v6468_v32 = vpop.f32.mrb[15].mxu1 }
 0x3b7   :  { %v5512_v37 = vadd.f32 %v6444_v29, %v6329_v27 }
 0x3b9   :  { %v5552_v38 = vadd.f32 %v6466_v31, %v5512_v37 }
 0x3d3   :  { %v6486_v39 = vpop.f32.mrb[16].mxu0 }
 0x3d4   :  { %v6508_v40 = vpop.f32.mrb[16].mxu1  ;;  %v6487_v60 = vpop.f32.mrb[17].mxu0 }
 0x3d5   :  { %v6488_v41 = vadd.f32 %v6487_v60, %v6486_v39  ;;  %v6509_v17 = vpop.f32.mrb[17].mxu1  ;;  %v6489_v42 = vpop.f32.mrb[18].mxu0 }
 0x3d6   :  { %v6510_v43 = vadd.f32 %v6509_v17, %v6508_v40  ;;  %v6511_v44 = vpop.f32.mrb[18].mxu1  ;;  %v6490_v45 = vpop.f32.mrb[19].mxu0 }
 0x3d7   :  { %v5592_v46 = vadd.f32 %v6488_v41, %v5552_v38  ;;  %v6512_v47 = vpop.f32.mrb[19].mxu1 }
 0x3d9   :  { %v5632_v7 = vadd.f32 %v6510_v43, %v5592_v46 }
 0x46f   :  { %v6530_v8 = vpop.f32.mrb[20].mxu0  ;;  %v6552_v49 = vpop.f32.mrb[20].mxu1 }
 0x470   :  { %v6531_v50 = vpop.f32.mrb[21].mxu0  ;;  %v6553_v51 = vpop.f32.mrb[21].mxu1 }
 0x471   :  { %v6532_v20 = vadd.f32 %v6531_v50, %v6530_v8  ;;  %v6554_v25 = vadd.f32 %v6553_v51, %v6552_v49  ;;  %v6533_v9 = vpop.f32.mrb[22].mxu0  ;;  %v6555_v10 = vpop.f32.mrb[22].mxu1 }
 0x472   :  { %v6534_v52 = vpop.f32.mrb[23].mxu0  ;;  %v6556_v53 = vpop.f32.mrb[23].mxu1 }
 0x473   :  { %v5672_v54 = vadd.f32 %v6532_v20, %v5632_v7 }
 0x475   :  { %v5712_v55 = vadd.f32 %v6554_v25, %v5672_v54 }
 0x477   :  { %5717 = vst [vmem:[#allocation11] sm:$0xff] %v5712_v55 }
 0x478   :  { %7752 = shalt.err (!%p7749_p2)
}
 0x479   :  { %s7753_s6 = scalar_lea.hbm %s8011_s5, 128 }
 0x47a   :  { %p7754_p3 = scmp.ne.s32.totalorder %s8011_s5, %s7753_s6  ;;  %p7757_p4 = scmp.lt.u32.totalorder %s7753_s6, %s8011_s5 }
 0x47c   :  { %p7759_p5 = pnand %p7757_p4, %p7754_p3 }
 0x47e   :  { %7762 = shalt.err (!%p7759_p5)
}
 0x47f   :  { %5727 = dma.vmem_to_hbm [thread:$0]  %s5725_s28, 128, %s8011_s5, [#allocation4]  }
 0x480   :  { %7769 = dma.done.wait [#allocation4], 128  }
 0x481   :  { %7770 = vsyncadd [#allocation4], 4294967168 }
 0x482   :  { %5731 = vsyncpa [#allocation3], 1 }
 0x483   :  { %5732 = vsyncpa [#allocation6], 1 }
 0x484   :  { %5733 = vsyncpa [#allocation9], 1 }
 0x485   :  { %5734 = vsyncpa [#allocation4], 1 }

</bundles_post_ra>
